<compile_context>
chip_gen: v6e
topology: v6e:2x2x1
jax: 0.10.0
libtpu: 0.0.40
codegen_flags: <defaults>
</compile_context>

<pallas_src>
import functools

import jax
import jax.numpy as jnp
from jax.experimental import pallas as pl
from jax.experimental.pallas import tpu as pltpu


def _round_up(n, m):
    return ((n + m - 1) // m) * m


def _pad2(a, rows, cols):
    r, c = a.shape
    return jnp.pad(a, ((0, rows - r), (0, cols - c)))


def _vae_kernel(x_ref, eps_ref,
                w1_ref, b1_ref,
                w2_ref, b2_ref,      # fused mu|logvar head: [hid_p, 2*lat_p]
                w3_ref, b3_ref,
                w4_ref, b4_ref,
                recon_ref, ml_ref,   # bf16 outputs: [tb, in_p], [tb, 2*lat_p]
                *, lat_pad):
    cdt = w1_ref.dtype  # matmul compute dtype (bf16); f32 accumulation throughout

    x = x_ref[...]                                               # [tb, in_p] bf16

    # ---- encode ----
    h1 = jnp.dot(x, w1_ref[...], preferred_element_type=jnp.float32) + b1_ref[...]
    h1 = jnp.maximum(h1, 0.0)                                    # ReLU (f32 VPU)

    # fused fc21|fc22: one MXU pass, lane-dense [tb, 2*lat_p] result
    ml = jnp.dot(h1.astype(cdt), w2_ref[...],
                 preferred_element_type=jnp.float32) + b2_ref[...]
    mu = ml[:, :lat_pad]                                         # 128-lane-aligned split
    logvar = ml[:, lat_pad:]

    # ---- reparameterize: z = mu + eps * exp(0.5 * logvar) ----
    std = jnp.exp(0.5 * logvar)                                  # EUP
    eps = eps_ref[...].astype(jnp.float32)                       # bf16 -> f32
    z = mu + eps * std

    # ---- decode ----
    h3 = jnp.dot(z.astype(cdt), w3_ref[...],
                 preferred_element_type=jnp.float32) + b3_ref[...]
    h3 = jnp.maximum(h3, 0.0)
    logits = jnp.dot(h3.astype(cdt), w4_ref[...],
                     preferred_element_type=jnp.float32) + b4_ref[...]
    # sigmoid via tanh: single EUP op, no overflow path, exact (no approx rcp)
    recon = 0.5 * (jnp.tanh(0.5 * logits) + 1.0)

    recon_ref[...] = recon.astype(recon_ref.dtype)
    ml_ref[...] = ml.astype(ml_ref.dtype)


def prepare_vae_params(params, compute_dtype=jnp.bfloat16):
    """One-time preparation: pad every weight/bias to 128-lane multiples,
    concatenate the fc21|fc22 head, cast matmul operands to bf16.
    Call once and reuse the result for every vae_forward call."""
    input_dim, hidden_dim = params["w1"].shape
    latent_dim = params["w21"].shape[1]
    in_p = _round_up(input_dim, 128)
    hid_p = _round_up(hidden_dim, 128)
    lat_p = _round_up(latent_dim, 128)

    prepped = dict(
        w1=_pad2(params["w1"], in_p, hid_p).astype(compute_dtype),
        b1=_pad2(params["b1"], 1, hid_p).astype(jnp.float32),
        w2=jnp.concatenate(
            [_pad2(params["w21"], hid_p, lat_p),
             _pad2(params["w22"], hid_p, lat_p)], axis=1).astype(compute_dtype),
        b2=jnp.concatenate(
            [_pad2(params["b21"], 1, lat_p),
             _pad2(params["b22"], 1, lat_p)], axis=1).astype(jnp.float32),
        w3=_pad2(params["w3"], lat_p, hid_p).astype(compute_dtype),
        b3=_pad2(params["b3"], 1, hid_p).astype(jnp.float32),
        w4=_pad2(params["w4"], hid_p, in_p).astype(compute_dtype),
        b4=_pad2(params["b4"], 1, in_p).astype(jnp.float32),
    )
    return jax.tree_util.tree_map(jnp.asarray, prepped)


@functools.partial(jax.jit, static_argnames=("block_b", "compute_dtype"))
def vae_forward(x, eps, prepped, *, block_b=512, compute_dtype=jnp.bfloat16):
    """VAE forward in one Pallas kernel, tiled over the batch dimension.

    x:   [B, input_dim]   input
    eps: [B, latent_dim]  the torch.randn_like noise, drawn host-side
    prepped: output of prepare_vae_params (padded / bf16-cast weights)
    Returns (recon, mu, logvar) in float32, matching the PyTorch forward.
    """
    B, input_dim = x.shape
    latent_dim = eps.shape[1]
    out_dtype = compute_dtype  # kernel outputs bf16; upcast host-side

    # padded (lane-dense) feature dims, taken from the prepared weights
    in_p = prepped["w1"].shape[0]
    hid_p = prepped["w1"].shape[1]
    lat_p = prepped["w3"].shape[0]

    # Batch tiling: multiple of 16 sublanes (bf16 vreg = 16 rows); aim for a
    # 2-step grid so v7x's two TensorCores each take one tile while v5e/v6e
    # only pay ~2 grid-step overheads.  Caps at block_b to bound VMEM.
    half = -(-B // 2)
    tb = max(16, min(block_b, _round_up(half, 16)))
    b_pad = _round_up(B, tb)
    grid = (b_pad // tb,)

    # per-call activation padding (cheap; fuses under jit)
    x_p = _pad2(x, b_pad, in_p).astype(compute_dtype)
    eps_p = _pad2(eps, b_pad, lat_p).astype(compute_dtype)   # bf16 eps: half the DMA

    # activations tile over the batch grid; weights/biases are grid-invariant
    # full-array VMEM blocks (same block index every step -> stay resident)
    act = lambda cols: pl.BlockSpec((tb, cols), lambda i: (i, 0))
    full = lambda rows, cols: pl.BlockSpec((rows, cols), lambda i: (0, 0))

    in_specs = [
        act(in_p),                 # x
        act(lat_p),                # eps
        full(in_p, hid_p),         # w1
        full(1, hid_p),            # b1
        full(hid_p, 2 * lat_p),    # w2 (fused mu|logvar)
        full(1, 2 * lat_p),        # b2
        full(lat_p, hid_p),        # w3
        full(1, hid_p),            # b3
        full(hid_p, in_p),         # w4
        full(1, in_p),             # b4
    ]
    out_specs = (act(in_p), act(2 * lat_p))
    out_shapes = (
        jax.ShapeDtypeStruct((b_pad, in_p), out_dtype),        # recon (padded)
        jax.ShapeDtypeStruct((b_pad, 2 * lat_p), out_dtype),   # mu|logvar (padded)
    )

    recon_p, ml_p = pl.pallas_call(
        functools.partial(_vae_kernel, lat_pad=lat_p),
        grid=grid,
        in_specs=in_specs,
        out_specs=out_specs,
        out_shape=out_shapes,
        compiler_params=pltpu.CompilerParams(
            dimension_semantics=("parallel",),   # megacore-shards batch on v7x
        ),
    )(x_p, eps_p,
      prepped["w1"], prepped["b1"], prepped["w2"], prepped["b2"],
      prepped["w3"], prepped["b3"], prepped["w4"], prepped["b4"])

    # slice the batch/lane padding off and upcast to f32 for the caller
    recon = recon_p[:B, :input_dim].astype(jnp.float32)
    mu = ml_p[:B, :latent_dim].astype(jnp.float32)
    logvar = ml_p[:B, lat_p:lat_p + latent_dim].astype(jnp.float32)
    return recon, mu, logvar


def init_vae_params(key, input_dim, hidden_dim, latent_dim, dtype=jnp.float32):
    """PyTorch-like init: U(-1/sqrt(fan_in), 1/sqrt(fan_in)); weights stored [in, out]."""
    def linear(k, fan_in, fan_out):
        kw, kb = jax.random.split(k)
        bound = 1.0 / jnp.sqrt(fan_in)
        w = jax.random.uniform(kw, (fan_in, fan_out), dtype, -bound, bound)
        b = jax.random.uniform(kb, (1, fan_out), dtype, -bound, bound)
        return w, b

    k1, k21, k22, k3, k4 = jax.random.split(key, 5)
    w1, b1 = linear(k1, input_dim, hidden_dim)
    w21, b21 = linear(k21, hidden_dim, latent_dim)
    w22, b22 = linear(k22, hidden_dim, latent_dim)
    w3, b3 = linear(k3, latent_dim, hidden_dim)
    w4, b4 = linear(k4, hidden_dim, input_dim)
    return dict(w1=w1, b1=b1, w21=w21, b21=b21, w22=w22, b22=b22,
                w3=w3, b3=b3, w4=w4, b4=b4)


def vae_forward_ref(x, eps, p, compute_dtype=jnp.bfloat16):
    """Pure-JAX reference of the PyTorch forward, mirroring the kernel's bf16
    matmul operands (f32 accumulation) and bf16-quantized eps so the comparison
    is apples-to-apples; outputs stay f32."""
    def mm(a, w):
        return jnp.dot(a.astype(compute_dtype), w.astype(compute_dtype),
                       preferred_element_type=jnp.float32)
    h1 = jax.nn.relu(mm(x, p["w1"]) + p["b1"])
    mu = mm(h1, p["w21"]) + p["b21"]
    logvar = mm(h1, p["w22"]) + p["b22"]
    eps_q = eps.astype(compute_dtype).astype(jnp.float32)
    z = mu + eps_q * jnp.exp(0.5 * logvar)
    h3 = jax.nn.relu(mm(z, p["w3"]) + p["b3"])
    recon = jax.nn.sigmoid(mm(h3, p["w4"]) + p["b4"])
    return recon, mu, logvar


if __name__ == "__main__":
    # Dims match the module's Linear stack; B chosen as a non-multiple of the
    # batch tile to exercise padding and the 2-step batch grid.
    B, INPUT_DIM, HIDDEN_DIM, LATENT_DIM = 500, 32, 64, 16

    key = jax.random.PRNGKey(0)
    k_x, k_eps, k_par = jax.random.split(key, 3)

    x = jax.random.normal(k_x, (B, INPUT_DIM), jnp.float32)
    # eps is the torch.randn_like noise from reparameterize(), drawn host-side
    # so the kernel is deterministic and testable.
    eps = jax.random.normal(k_eps, (B, LATENT_DIM), jnp.float32)
    params = init_vae_params(k_par, INPUT_DIM, HIDDEN_DIM, LATENT_DIM)

    # one-time weight preparation (pad + fuse + bf16 cast), reused across calls
    prepped = prepare_vae_params(params)
    jax.block_until_ready(prepped)

    recon, mu, logvar = vae_forward(x, eps, prepped)
    jax.block_until_ready((recon, mu, logvar))

    # Correctness check against a pure-JAX reference of the PyTorch forward.
    # Tolerances cover the bf16 output quantization (rel ~4e-3) on top of the
    # shared bf16-operand matmul path.
    r_ref, mu_ref, lv_ref = vae_forward_ref(x, eps, params)
    assert recon.shape == (B, INPUT_DIM)
    assert mu.shape == (B, LATENT_DIM) and logvar.shape == (B, LATENT_DIM)
    assert jnp.allclose(mu, mu_ref, atol=2e-2, rtol=2e-2), \
        float(jnp.max(jnp.abs(mu - mu_ref)))
    assert jnp.allclose(logvar, lv_ref, atol=2e-2, rtol=2e-2), \
        float(jnp.max(jnp.abs(logvar - lv_ref)))
    assert jnp.allclose(recon, r_ref, atol=2e-2, rtol=2e-2), \
        float(jnp.max(jnp.abs(recon - r_ref)))

    print("KERNEL_OK")
</pallas_src>

<mosaic_0001>
module attributes {stable_mosaic.version = 11 : i64} {
  func.func @_vae_kernel(%arg0: i32, %arg1: memref<256x128xbf16, #tpu.memory_space<vmem>>, %arg2: memref<256x128xbf16, #tpu.memory_space<vmem>>, %arg3: memref<128x128xbf16, #tpu.memory_space<vmem>>, %arg4: memref<1x128xf32, #tpu.memory_space<vmem>>, %arg5: memref<128x256xbf16, #tpu.memory_space<vmem>>, %arg6: memref<1x256xf32, #tpu.memory_space<vmem>>, %arg7: memref<128x128xbf16, #tpu.memory_space<vmem>>, %arg8: memref<1x128xf32, #tpu.memory_space<vmem>>, %arg9: memref<128x128xbf16, #tpu.memory_space<vmem>>, %arg10: memref<1x128xf32, #tpu.memory_space<vmem>>, %arg11: memref<256x128xbf16, #tpu.memory_space<vmem>>, %arg12: memref<256x256xbf16, #tpu.memory_space<vmem>>) attributes {dimension_semantics = [#tpu.dimension_semantics<parallel>], iteration_bounds = array<i64: 2>, scalar_prefetch = 0 : i64, scratch_operands = 0 : i64, tpu.core_type = #tpu.core_type<tc>, window_params = [{transform_indices = @transform_0, window_bounds = array<i64: 256, 128>}, {transform_indices = @transform_1, window_bounds = array<i64: 256, 128>}, {pipeline_mode = #tpu.pipeline_mode<synchronous>, transform_indices = @transform_2, window_bounds = array<i64: 128, 128>}, {pipeline_mode = #tpu.pipeline_mode<synchronous>, transform_indices = @transform_3, window_bounds = array<i64: 1, 128>}, {pipeline_mode = #tpu.pipeline_mode<synchronous>, transform_indices = @transform_4, window_bounds = array<i64: 128, 256>}, {pipeline_mode = #tpu.pipeline_mode<synchronous>, transform_indices = @transform_5, window_bounds = array<i64: 1, 256>}, {pipeline_mode = #tpu.pipeline_mode<synchronous>, transform_indices = @transform_6, window_bounds = array<i64: 128, 128>}, {pipeline_mode = #tpu.pipeline_mode<synchronous>, transform_indices = @transform_7, window_bounds = array<i64: 1, 128>}, {pipeline_mode = #tpu.pipeline_mode<synchronous>, transform_indices = @transform_8, window_bounds = array<i64: 128, 128>}, {pipeline_mode = #tpu.pipeline_mode<synchronous>, transform_indices = @transform_9, window_bounds = array<i64: 1, 128>}, {transform_indices = @transform_10, window_bounds = array<i64: 256, 128>}, {transform_indices = @transform_11, window_bounds = array<i64: 256, 256>}]} {
    %c0 = arith.constant 0 : index
    %c0_0 = arith.constant 0 : index
    %0 = vector.load %arg1[%c0, %c0_0] : memref<256x128xbf16, #tpu.memory_space<vmem>>, vector<256x128xbf16>
    %c0_1 = arith.constant 0 : index
    %c0_2 = arith.constant 0 : index
    %1 = vector.load %arg3[%c0_1, %c0_2] : memref<128x128xbf16, #tpu.memory_space<vmem>>, vector<128x128xbf16>
    %cst = arith.constant dense<0.000000e+00> : vector<256x128xf32>
    %2 = tpu.matmul %0, %1, %cst {dimension_numbers = #tpu.dot_dimension_numbers<[1], [0], [0], [1], [0, 0, 1, 1], [], []>} : vector<256x128xbf16>, vector<128x128xbf16>, vector<256x128xf32> -> vector<256x128xf32>
    %c0_3 = arith.constant 0 : index
    %c0_4 = arith.constant 0 : index
    %3 = vector.load %arg4[%c0_3, %c0_4] : memref<1x128xf32, #tpu.memory_space<vmem>>, vector<1x128xf32>
    %4 = vector.broadcast %3 : vector<1x128xf32> to vector<256x128xf32>
    %5 = arith.addf %2, %4 : vector<256x128xf32>
    %cst_5 = arith.constant 0.000000e+00 : f32
    %6 = vector.broadcast %cst_5 : f32 to vector<256x128xf32>
    %7 = arith.maximumf %5, %6 : vector<256x128xf32>
    %8 = arith.truncf %7 : vector<256x128xf32> to vector<256x128xbf16>
    %c0_6 = arith.constant 0 : index
    %c0_7 = arith.constant 0 : index
    %9 = vector.load %arg5[%c0_6, %c0_7] : memref<128x256xbf16, #tpu.memory_space<vmem>>, vector<128x256xbf16>
    %cst_8 = arith.constant dense<0.000000e+00> : vector<256x256xf32>
    %10 = tpu.matmul %8, %9, %cst_8 {dimension_numbers = #tpu.dot_dimension_numbers<[1], [0], [0], [1], [0, 0, 1, 1], [], []>} : vector<256x128xbf16>, vector<128x256xbf16>, vector<256x256xf32> -> vector<256x256xf32>
    %c0_9 = arith.constant 0 : index
    %c0_10 = arith.constant 0 : index
    %11 = vector.load %arg6[%c0_9, %c0_10] : memref<1x256xf32, #tpu.memory_space<vmem>>, vector<1x256xf32>
    %12 = vector.broadcast %11 : vector<1x256xf32> to vector<256x256xf32>
    %13 = arith.addf %10, %12 : vector<256x256xf32>
    %14 = vector.extract_strided_slice %13 {offsets = [0, 0], sizes = [256, 128], strides = [1, 1]} : vector<256x256xf32> to vector<256x128xf32>
    %15 = vector.extract_strided_slice %13 {offsets = [0, 128], sizes = [256, 128], strides = [1, 1]} : vector<256x256xf32> to vector<256x128xf32>
    %cst_11 = arith.constant 5.000000e-01 : f32
    %16 = vector.broadcast %cst_11 : f32 to vector<256x128xf32>
    %17 = arith.mulf %16, %15 : vector<256x128xf32>
    %18 = math.exp %17 : vector<256x128xf32>
    %c0_12 = arith.constant 0 : index
    %c0_13 = arith.constant 0 : index
    %19 = vector.load %arg2[%c0_12, %c0_13] : memref<256x128xbf16, #tpu.memory_space<vmem>>, vector<256x128xbf16>
    %20 = arith.extf %19 : vector<256x128xbf16> to vector<256x128xf32>
    %21 = arith.mulf %20, %18 : vector<256x128xf32>
    %22 = arith.addf %14, %21 : vector<256x128xf32>
    %23 = arith.truncf %22 : vector<256x128xf32> to vector<256x128xbf16>
    %c0_14 = arith.constant 0 : index
    %c0_15 = arith.constant 0 : index
    %24 = vector.load %arg7[%c0_14, %c0_15] : memref<128x128xbf16, #tpu.memory_space<vmem>>, vector<128x128xbf16>
    %cst_16 = arith.constant dense<0.000000e+00> : vector<256x128xf32>
    %25 = tpu.matmul %23, %24, %cst_16 {dimension_numbers = #tpu.dot_dimension_numbers<[1], [0], [0], [1], [0, 0, 1, 1], [], []>} : vector<256x128xbf16>, vector<128x128xbf16>, vector<256x128xf32> -> vector<256x128xf32>
    %c0_17 = arith.constant 0 : index
    %c0_18 = arith.constant 0 : index
    %26 = vector.load %arg8[%c0_17, %c0_18] : memref<1x128xf32, #tpu.memory_space<vmem>>, vector<1x128xf32>
    %27 = vector.broadcast %26 : vector<1x128xf32> to vector<256x128xf32>
    %28 = arith.addf %25, %27 : vector<256x128xf32>
    %cst_19 = arith.constant 0.000000e+00 : f32
    %29 = vector.broadcast %cst_19 : f32 to vector<256x128xf32>
    %30 = arith.maximumf %28, %29 : vector<256x128xf32>
    %31 = arith.truncf %30 : vector<256x128xf32> to vector<256x128xbf16>
    %c0_20 = arith.constant 0 : index
    %c0_21 = arith.constant 0 : index
    %32 = vector.load %arg9[%c0_20, %c0_21] : memref<128x128xbf16, #tpu.memory_space<vmem>>, vector<128x128xbf16>
    %cst_22 = arith.constant dense<0.000000e+00> : vector<256x128xf32>
    %33 = tpu.matmul %31, %32, %cst_22 {dimension_numbers = #tpu.dot_dimension_numbers<[1], [0], [0], [1], [0, 0, 1, 1], [], []>} : vector<256x128xbf16>, vector<128x128xbf16>, vector<256x128xf32> -> vector<256x128xf32>
    %c0_23 = arith.constant 0 : index
    %c0_24 = arith.constant 0 : index
    %34 = vector.load %arg10[%c0_23, %c0_24] : memref<1x128xf32, #tpu.memory_space<vmem>>, vector<1x128xf32>
    %35 = vector.broadcast %34 : vector<1x128xf32> to vector<256x128xf32>
    %36 = arith.addf %33, %35 : vector<256x128xf32>
    %cst_25 = arith.constant 5.000000e-01 : f32
    %37 = vector.broadcast %cst_25 : f32 to vector<256x128xf32>
    %38 = arith.mulf %37, %36 : vector<256x128xf32>
    %39 = math.tanh %38 : vector<256x128xf32>
    %cst_26 = arith.constant 1.000000e+00 : f32
    %40 = vector.broadcast %cst_26 : f32 to vector<256x128xf32>
    %41 = arith.addf %39, %40 : vector<256x128xf32>
    %cst_27 = arith.constant 5.000000e-01 : f32
    %42 = vector.broadcast %cst_27 : f32 to vector<256x128xf32>
    %43 = arith.mulf %42, %41 : vector<256x128xf32>
    %44 = arith.truncf %43 : vector<256x128xf32> to vector<256x128xbf16>
    %c0_28 = arith.constant 0 : index
    %c0_29 = arith.constant 0 : index
    %45 = vector.load %arg11[%c0_28, %c0_29] : memref<256x128xbf16, #tpu.memory_space<vmem>>, vector<256x128xbf16>
    tpu.vector_store %arg11[%c0_28, %c0_29], %44 {strides = array<i32>} : memref<256x128xbf16, #tpu.memory_space<vmem>>, vector<256x128xbf16>,
    %46 = arith.truncf %13 : vector<256x256xf32> to vector<256x256xbf16>
    %c0_30 = arith.constant 0 : index
    %c0_31 = arith.constant 0 : index
    %47 = vector.load %arg12[%c0_30, %c0_31] : memref<256x256xbf16, #tpu.memory_space<vmem>>, vector<256x256xbf16>
    tpu.vector_store %arg12[%c0_30, %c0_31], %46 {strides = array<i32>} : memref<256x256xbf16, #tpu.memory_space<vmem>>, vector<256x256xbf16>,
    return
  }
  func.func @transform_0(%arg0: i32) -> (i32, i32) {
    %c0_i32 = arith.constant 0 : i32
    %c0_i32_0 = arith.constant 0 : i32
    return %arg0, %c0_i32 : i32, i32
  }
  func.func @transform_1(%arg0: i32) -> (i32, i32) {
    %c0_i32 = arith.constant 0 : i32
    %c0_i32_0 = arith.constant 0 : i32
    return %arg0, %c0_i32 : i32, i32
  }
  func.func @transform_2(%arg0: i32) -> (i32, i32) {
    %c0_i32 = arith.constant 0 : i32
    %c0_i32_0 = arith.constant 0 : i32
    %c0_i32_1 = arith.constant 0 : i32
    return %c0_i32, %c0_i32_0 : i32, i32
  }
  func.func @transform_3(%arg0: i32) -> (i32, i32) {
    %c0_i32 = arith.constant 0 : i32
    %c0_i32_0 = arith.constant 0 : i32
    %c0_i32_1 = arith.constant 0 : i32
    return %c0_i32, %c0_i32_0 : i32, i32
  }
  func.func @transform_4(%arg0: i32) -> (i32, i32) {
    %c0_i32 = arith.constant 0 : i32
    %c0_i32_0 = arith.constant 0 : i32
    %c0_i32_1 = arith.constant 0 : i32
    return %c0_i32, %c0_i32_0 : i32, i32
  }
  func.func @transform_5(%arg0: i32) -> (i32, i32) {
    %c0_i32 = arith.constant 0 : i32
    %c0_i32_0 = arith.constant 0 : i32
    %c0_i32_1 = arith.constant 0 : i32
    return %c0_i32, %c0_i32_0 : i32, i32
  }
  func.func @transform_6(%arg0: i32) -> (i32, i32) {
    %c0_i32 = arith.constant 0 : i32
    %c0_i32_0 = arith.constant 0 : i32
    %c0_i32_1 = arith.constant 0 : i32
    return %c0_i32, %c0_i32_0 : i32, i32
  }
  func.func @transform_7(%arg0: i32) -> (i32, i32) {
    %c0_i32 = arith.constant 0 : i32
    %c0_i32_0 = arith.constant 0 : i32
    %c0_i32_1 = arith.constant 0 : i32
    return %c0_i32, %c0_i32_0 : i32, i32
  }
  func.func @transform_8(%arg0: i32) -> (i32, i32) {
    %c0_i32 = arith.constant 0 : i32
    %c0_i32_0 = arith.constant 0 : i32
    %c0_i32_1 = arith.constant 0 : i32
    return %c0_i32, %c0_i32_0 : i32, i32
  }
  func.func @transform_9(%arg0: i32) -> (i32, i32) {
    %c0_i32 = arith.constant 0 : i32
    %c0_i32_0 = arith.constant 0 : i32
    %c0_i32_1 = arith.constant 0 : i32
    return %c0_i32, %c0_i32_0 : i32, i32
  }
  func.func @transform_10(%arg0: i32) -> (i32, i32) {
    %c0_i32 = arith.constant 0 : i32
    %c0_i32_0 = arith.constant 0 : i32
    return %arg0, %c0_i32 : i32, i32
  }
  func.func @transform_11(%arg0: i32) -> (i32, i32) {
    %c0_i32 = arith.constant 0 : i32
    %c0_i32_0 = arith.constant 0 : i32
    return %arg0, %c0_i32 : i32, i32
  }
}

</mosaic_0001>

<bundles_post_ra>
// kernel: vae_forward.1
= control target key start
LH: loop header
LB: loop body
LE: loop exit
PB: predicated region body
PF: predicated region fallthrough
CT: control target
= control target key end

     0   :  { %s3386_s17 = smov 0   ;;  %s3944_s0 = inlined_call_operand.vmem [shape: bf16[512,128], index: 0, kind: input, shape index: {}]   ;;  %s3945_s1 = inlined_call_operand.vmem [shape: bf16[512,128], index: 1, kind: input, shape index: {}]   ;;  %s3946_s2 = inlined_call_operand.vmem [shape: bf16[128,128], index: 2, kind: input, shape index: {}]   ;;  %s3947_s3 = inlined_call_operand.vmem [shape: f32[1,128], index: 3, kind: input, shape index: {}]   ;;  %s3948_s4 = inlined_call_operand.vmem [shape: bf16[128,256], index: 4, kind: input, shape index: {}]   ;;  %s3949_s5 = inlined_call_operand.vmem [shape: f32[1,256], index: 5, kind: input, shape index: {}]   ;;  %s3950_s6 = inlined_call_operand.vmem [shape: bf16[128,128], index: 6, kind: input, shape index: {}]   ;;  %s3951_s7 = inlined_call_operand.vmem [shape: f32[1,128], index: 7, kind: input, shape index: {}]   ;;  %s3952_s8 = inlined_call_operand.vmem [shape: bf16[128,128], index: 8, kind: input, shape index: {}]   ;;  %s3953_s9 = inlined_call_operand.vmem [shape: f32[1,128], index: 9, kind: input, shape index: {}]   ;;  %s3954_s10 = inlined_call_operand.vmem [shape: bf16[512,128], index: 10, kind: output, shape index: {0}]   ;;  %s3955_s11 = inlined_call_operand.vmem [shape: bf16[512,256], index: 11, kind: output, shape index: {1}]  }
   0x1 LB: > { %s2506_s18 = sadd.s32 4294967295, %s3323_s17   ;;  %p2510_p0 = scmp.ge.s32.totalorder %s3323_s17, 1  ;;  %s3323_s17 = sphi %s3386_s17, %s22_s17  }
   0x2   : > { %p352_p1 = scmp.lt.s32.totalorder %s3323_s17, 3 }
   0x4   : > { %p353_p2 = pnand %p2510_p0, %p352_p1 }
   0x5   : > { %s2511_s21 = sshll.u32 (!%p353_p2), %s2506_s18, 5 }
   0x6   : > { %356 = sbr.rel (%p353_p2) target bundleno = 1024 (0x400), region = 60  ;;  %p404_p3 = scmp.lt.s32.totalorder (!%p353_p2), %s2511_s21, 63 }
   0xb   : > { %v3125_v0 = vld [vmem:[%s3946_s2 + $0x38] sm:$0xff]   ;;  %v3126_v1 = vld [vmem:[%s3946_s2 + $0x30] sm:$0xff]   ;;  %s3957_s21 = smov (!%p404_p3, %s2511_s21), 63  ;;  %v3127_v2 = vld [vmem:[%s3946_s2 + $0x28] sm:$0xff]   ;;  %v3325_v40 = vmov 0  }
   0xc   : > { %2956 = vmatprep.subr.bf16.mxu0 %v3125_v0  ;;  %3100 = vmatprep.subr.bf16.mxu1 %v3125_v0  ;;  %s3406_s26 = sshll.u32 %s3957_s21, 2  ;;  %v3128_v3 = vld [vmem:[%s3946_s2 + $0x20] sm:$0xff]   ;;  %v3129_v5 = vld [vmem:[%s3946_s2 + $0x18] sm:$0xff]   ;;  %v3130_v6 = vld [vmem:[%s3946_s2 + $0x10] sm:$0xff]   ;;  %s2645_s30 = sshll.u32 %s3957_s21, 3 }
   0xd   : > { %2957 = vmatpush3.bf16.msra.mxu0 %v3125_v0  ;;  %3108 = vmatpush3.bf16.msra.mxu1 %v3125_v0  ;;  %s3412_s29 = scalar_lea.vmem %s3944_s0, %s3406_s26  ;;  %v3131_v8 = vld [vmem:[%s3946_s2 + $0x8] sm:$0xff]   ;;  %v3132_v9 = vld [vmem:[%s3946_s2] sm:$0xff]   ;;  %v3151_v11 = vld [vmem:[%s3948_s4 + $0x74] ss:$8 sps:$4 sm:$0xff]   ;;  %s3585_s14 = scalar_lea.vmem %s3955_s11, %s2645_s30 }
   0xe   : > { %2958 = vmatprep.subr.bf16.mxu0 %v3126_v1  ;;  %3101 = vmatprep.subr.bf16.mxu1 %v3126_v1  ;;  %v3133_v4 = vld [vmem:[%s3412_s29] sm:$0xff]   ;;  %v3134_v10 = vld [vmem:[%s3412_s29 + $0x8] sm:$0xff]   ;;  %v3135_v12 = vld [vmem:[%s3412_s29 + $0x10] sm:$0xff]   ;;  %s3609_s16 = scalar_lea.vmem %s3945_s1, %s3406_s26  ;;  %s3899_s23 = scalar_lea.vmem %s3954_s10, %s3406_s26 }
   0xf   : > { %2972 = vmatprep.mubr.bf16.mxu0 %v3133_v4  ;;  %v3141_v7 = vld [vmem:[%s3412_s29 + $0x40] sm:$0xff]   ;;  %v3142_v13 = vld [vmem:[%s3412_s29 + $0x48] sm:$0xff]   ;;  %v3143_v14 = vld [vmem:[%s3412_s29 + $0x50] sm:$0xff]  }
  0x10   : > { %2988 = vmatprep.mubr.bf16.mxu1 %v3141_v7  ;;  %v3149_v15 = vld [vmem:[%s3948_s4 + $0x70] ss:$8 sps:$4 sm:$0xff]   ;;  %v3154_v16 = vld [vmem:[%s3948_s4 + $0x64] ss:$8 sps:$4 sm:$0xff]   ;;  %v3152_v17 = vld [vmem:[%s3948_s4 + $0x60] ss:$8 sps:$4 sm:$0xff]  }
  0x11   : > { %2959 = vmatpush3.bf16.msra.mxu0 %v3126_v1  ;;  %3109 = vmatpush3.bf16.msra.mxu1 %v3126_v1  ;;  %v3157_v18 = vld [vmem:[%s3948_s4 + $0x54] ss:$8 sps:$4 sm:$0xff]   ;;  %v3137_v21 = vld [vmem:[%s3412_s29 + $0x20] sm:$0xff]   ;;  %v3155_v23 = vld [vmem:[%s3948_s4 + $0x50] ss:$8 sps:$4 sm:$0xff]  }
  0x12   : > { %2960 = vmatprep.subr.bf16.mxu0 %v3127_v2  ;;  %3102 = vmatprep.subr.bf16.mxu1 %v3127_v2  ;;  %v3136_v19 = vld [vmem:[%s3412_s29 + $0x18] sm:$0xff]   ;;  %v3145_v22 = vld [vmem:[%s3412_s29 + $0x60] sm:$0xff]   ;;  %v3138_v27 = vld [vmem:[%s3412_s29 + $0x28] sm:$0xff]  }
  0x13   : > { %v3144_v20 = vld [vmem:[%s3412_s29 + $0x58] sm:$0xff]   ;;  %v3160_v24 = vld [vmem:[%s3948_s4 + $0x44] ss:$8 sps:$4 sm:$0xff]   ;;  %v3158_v25 = vld [vmem:[%s3948_s4 + $0x40] ss:$8 sps:$4 sm:$0xff]  }
  0x14   : > { %v3163_v26 = vld [vmem:[%s3948_s4 + $0x34] ss:$8 sps:$4 sm:$0xff]   ;;  %v3146_v28 = vld [vmem:[%s3412_s29 + $0x68] sm:$0xff]   ;;  %v3161_v31 = vld [vmem:[%s3948_s4 + $0x30] ss:$8 sps:$4 sm:$0xff]  }
  0x15   : > { %2961 = vmatpush3.bf16.msra.mxu0 %v3127_v2  ;;  %3110 = vmatpush3.bf16.msra.mxu1 %v3127_v2  ;;  %v3139_v29 = vld [vmem:[%s3412_s29 + $0x30] sm:$0xff]   ;;  %v3140_v32 = vld [vmem:[%s3412_s29 + $0x38] sm:$0xff]   ;;  %v3166_v34 = vld [vmem:[%s3948_s4 + $0x24] ss:$8 sps:$4 sm:$0xff]  }
  0x16   : > { %2962 = vmatprep.subr.bf16.mxu0 %v3128_v3  ;;  %3103 = vmatprep.subr.bf16.mxu1 %v3128_v3  ;;  %v3147_v30 = vld [vmem:[%s3412_s29 + $0x70] sm:$0xff]   ;;  %v3148_v33 = vld [vmem:[%s3412_s29 + $0x78] sm:$0xff]   ;;  %v3164_v35 = vld [vmem:[%s3948_s4 + $0x20] ss:$8 sps:$4 sm:$0xff]  }
  0x17   : > { %v3169_v36 = vld [vmem:[%s3948_s4 + $0x14] ss:$8 sps:$4 sm:$0xff]   ;;  %v3167_v37 = vld [vmem:[%s3948_s4 + $0x10] ss:$8 sps:$4 sm:$0xff]   ;;  %v3172_v38 = vld [vmem:[%s3948_s4 + $0x4] ss:$8 sps:$4 sm:$0xff]  }
  0x18   : > { %v3170_v39 = vld [vmem:[%s3948_s4] ss:$8 sps:$4 sm:$0xff]  }
  0x19   : > { %2963 = vmatpush3.bf16.msra.mxu0 %v3128_v3  ;;  %3111 = vmatpush3.bf16.msra.mxu1 %v3128_v3  ;;  %v3497_v43 = vld [vmem:[%s3947_s3] ss:$0 sm:$0xff] }
  0x1a   : > { %2964 = vmatprep.subr.bf16.mxu0 %v3129_v5  ;;  %3104 = vmatprep.subr.bf16.mxu1 %v3129_v5 }
  0x1d   : > { %2965 = vmatpush3.bf16.msra.mxu0 %v3129_v5  ;;  %3112 = vmatpush3.bf16.msra.mxu1 %v3129_v5 }
  0x1e   : > { %2966 = vmatprep.subr.bf16.mxu0 %v3130_v6  ;;  %3105 = vmatprep.subr.bf16.mxu1 %v3130_v6 }
  0x21   : > { %2967 = vmatpush3.bf16.msra.mxu0 %v3130_v6  ;;  %3113 = vmatpush3.bf16.msra.mxu1 %v3130_v6 }
  0x22   : > { %2968 = vmatprep.subr.bf16.mxu0 %v3131_v8  ;;  %3106 = vmatprep.subr.bf16.mxu1 %v3131_v8 }
  0x25   : > { %2969 = vmatpush3.bf16.msra.mxu0 %v3131_v8  ;;  %3114 = vmatpush3.bf16.msra.mxu1 %v3131_v8 }
  0x26   : > { %2970 = vmatprep.subr.bf16.mxu0 %v3132_v9  ;;  %3107 = vmatprep.subr.bf16.mxu1 %v3132_v9 }
  0x29   : > { %2971 = vmatpush3.bf16.msra.mxu0 %v3132_v9  ;;  %3115 = vmatpush3.bf16.msra.mxu1 %v3132_v9 }
  0x2a   : > { %945 = vmatprep.subr.bf16.mxu1 %v3151_v11 }
  0x2c   : > { %2973 = vmatmul.mubr.bf16.vlgmr.msra.gmra.mxu0 %v3134_v10  ;;  %2989 = vmatmul.mubr.bf16.vlgmr.msra.gmra.mxu1 %v3142_v13 }
  0x2d   : > { %2976 = vmatprep.mubr.bf16.mxu0 %v3135_v12  ;;  %2992 = vmatprep.mubr.bf16.mxu1 %v3143_v14 }
  0x2e   : > { %946 = vmatpush1.bf16.msra.mxu1 %v3149_v15 }
  0x2f   : > { %947 = vmatprep.subr.bf16.mxu1 %v3154_v16 }
  0x32   : > { %948 = vmatpush1.bf16.msra.mxu1 %v3152_v17 }
  0x33   : > { %949 = vmatprep.subr.bf16.mxu1 %v3157_v18 }
  0x34   : > { %2977 = vmatmul.mubr.bf16.gmra.mxu0 %v3136_v19  ;;  %2993 = vmatmul.mubr.bf16.gmra.mxu1 %v3144_v20 }
  0x35   : > { %2980 = vmatprep.mubr.bf16.mxu0 %v3137_v21  ;;  %2996 = vmatprep.mubr.bf16.mxu1 %v3145_v22 }
  0x36   : > { %950 = vmatpush1.bf16.msra.mxu1 %v3155_v23 }
  0x37   : > { %951 = vmatprep.subr.bf16.mxu1 %v3160_v24 }
  0x3a   : > { %952 = vmatpush1.bf16.msra.mxu1 %v3158_v25 }
  0x3b   : > { %953 = vmatprep.subr.bf16.mxu1 %v3163_v26 }
  0x3c   : > { %2981 = vmatmul.mubr.bf16.gmra.mxu0 %v3138_v27  ;;  %2997 = vmatmul.mubr.bf16.gmra.mxu1 %v3146_v28 }
  0x3d   : > { %2984 = vmatprep.mubr.bf16.mxu0 %v3139_v29  ;;  %3000 = vmatprep.mubr.bf16.mxu1 %v3147_v30 }
  0x3e   : > { %954 = vmatpush1.bf16.msra.mxu1 %v3161_v31 }
  0x3f   : > { %955 = vmatprep.subr.bf16.mxu1 %v3166_v34 }
  0x42   : > { %956 = vmatpush1.bf16.msra.mxu1 %v3164_v35 }
  0x43   : > { %957 = vmatprep.subr.bf16.mxu1 %v3169_v36 }
  0x44   : > { %2985 = vmatmul.mubr.bf16.gmra.mxu0 %v3140_v32  ;;  %3001 = vmatmul.mubr.bf16.gmra.mxu1 %v3148_v33 }
  0x45   : > { %977 = vmatprep.mubr.bf16.mxu1 %v3325_v40 }
  0x46   : > { %958 = vmatpush1.bf16.msra.mxu1 %v3167_v37 }
  0x47   : > { %959 = vmatprep.subr.bf16.mxu1 %v3172_v38 }
  0x4a   : > { %960 = vmatpush1.bf16.msra.mxu1 %v3170_v39 }
  0xec   : > { %v2974_v41 = vpop.f32.mrf.mxu0  ;;  %v2990_v26 = vpop.f32.mrf.mxu1 }
  0xed   : > { %v671_v55 = vadd.f32 %v2974_v41, %v3497_v43 }
  0xee   : > { %v662_v42 = vpop.f32.mrf.mxu0  ;;  %v726_v29 = vpop.f32.mrf.mxu1 }
  0xef   : > { %v663_v45 = vadd.f32 %v3497_v43, %v662_v42  ;;  %v791_v58 = vmax.f32 %v671_v55, 0.0  ;;  %v727_v38 = vadd.f32 %v3497_v43, %v726_v29 }
  0xf0   : > { %v2975_v44 = vpop.f32.mrf.mxu0  ;;  %v2991_v33 = vpop.f32.mrf.mxu1 }
  0xf1   : > { %v789_v49 = vmax.f32 %v663_v45, 0.0  ;;  %v674_v52 = vadd.f32 %v2975_v44, %v3497_v43  ;;  %v805_v42 = vmax.f32 %v727_v38, 0.0 }
  0xf2   : > { %v665_v46 = vpop.f32.mrf.mxu0  ;;  %v729_v36 = vpop.f32.mrf.mxu1 }
  0xf3   : > { %v666_v47 = vadd.f32 %v3497_v43, %v665_v46  ;;  %v792_v56 = vmax.f32 %v674_v52, 0.0  ;;  %v730_v39 = vadd.f32 %v3497_v43, %v729_v36  ;;  %v735_v46 = vadd.f32 %v2990_v26, %v3497_v43 }
  0xf4   : > { %v2978_v48 = vpop.f32.mrf.mxu0  ;;  %v2994_v41 = vpop.f32.mrf.mxu1  ;;  %v855_v36 = vlaneseq }
  0xf5   : > { %v790_v50 = vmax.f32 %v666_v47, 0.0  ;;  %v822_v59 = vpack.c.bf16 %v792_v56, %v791_v58  ;;  %v687_v2 = vadd.f32 %v2978_v48, %v3497_v43  ;;  %v806_v44 = vmax.f32 %v730_v39, 0.0 }
  0xf6   : > { %v678_v51 = vpop.f32.mrf.mxu0  ;;  %v742_v45 = vpop.f32.mrf.mxu1  ;;  %v738_v47 = vadd.f32 %v2991_v33, %v3497_v43 }
  0xf7   : > { %v821_v53 = vpack.c.bf16 %v790_v50, %v789_v49  ;;  %v679_v60 = vadd.f32 %v3497_v43, %v678_v51  ;;  %v795_v6 = vmax.f32 %v687_v2, 0.0  ;;  %v829_v48 = vpack.c.bf16 %v806_v44, %v805_v42  ;;  %v3175_v2 = vld [vmem:[%s3950_s6 + $0x28] sm:$0xff]  }
  0xf8   : > { %v2979_v54 = vpop.f32.mrf.mxu0  ;;  %v2995_v49 = vpop.f32.mrf.mxu1  ;;  %v807_v50 = vmax.f32 %v735_v46, 0.0  ;;  %v808_v51 = vmax.f32 %v738_v47, 0.0 }
  0xf9   : > { %978 = vmatmul.mubr.bf16.vlgmr.msra.gmra.mxu1 %v821_v53  ;;  %v793_v63 = vmax.f32 %v679_v60, 0.0  ;;  %v690_v3 = vadd.f32 %v2979_v54, %v3497_v43  ;;  %v743_v54 = vadd.f32 %v3497_v43, %v742_v45 }
  0xfa   : > { %987 = vmatprep.mubr.bf16.mxu1 %v3325_v40  ;;  %v681_v57 = vpop.f32.mrf.mxu0  ;;  %v745_v52 = vpop.f32.mrf.mxu1  ;;  %v830_v53 = vpack.c.bf16 %v808_v51, %v807_v50 }
  0xfb   : > { %v682_v61 = vadd.f32 %v3497_v43, %v681_v57  ;;  %v796_v7 = vmax.f32 %v690_v3, 0.0  ;;  %v746_v55 = vadd.f32 %v3497_v43, %v745_v52  ;;  %v3173_v57 = vld [vmem:[%s3950_s6 + $0x38] sm:$0xff]   ;;  %v809_v58 = vmax.f32 %v743_v54, 0.0 }
  0xfc   : > { %v2982_v62 = vpop.f32.mrf.mxu0  ;;  %v2998_v56 = vpop.f32.mrf.mxu1  ;;  %3004 = vmatprep.subr.bf16.mxu0 %v3173_v57 }
  0xfd   : > { %v794_v0 = vmax.f32 %v682_v61, 0.0  ;;  %v824_v9 = vpack.c.bf16 %v796_v7, %v795_v6  ;;  %v703_v16 = vadd.f32 %v2982_v62, %v3497_v43  ;;  %3005 = vmatpush3.bf16.msra.mxu0 %v3173_v57  ;;  %v3174_v61 = vld [vmem:[%s3950_s6 + $0x30] sm:$0xff]   ;;  %v751_v62 = vadd.f32 %v2994_v41, %v3497_v43  ;;  %v3176_v6 = vld [vmem:[%s3950_s6 + $0x20] sm:$0xff]  }
  0xfe   : > { %v694_v1 = vpop.f32.mrf.mxu0  ;;  %v758_v60 = vpop.f32.mrf.mxu1  ;;  %3006 = vmatprep.subr.bf16.mxu0 %v3174_v61  ;;  %v853_v41 = vld [vmem:[%s3949_s5] sm:$0x3] }
  0xff   : > { %v823_v4 = vpack.c.bf16 %v794_v0, %v793_v63  ;;  %v695_v10 = vadd.f32 %v3497_v43, %v694_v1  ;;  %v799_v20 = vmax.f32 %v703_v16, 0.0  ;;  %v754_v63 = vadd.f32 %v2995_v49, %v3497_v43 }
 0x100   : > { %v2983_v5 = vpop.f32.mrf.mxu0  ;;  %v2999_v1 = vpop.f32.mrf.mxu1  ;;  %v811_v3 = vmax.f32 %v751_v62, 0.0  ;;  %v767_v16 = vadd.f32 %v2998_v56, %v3497_v43 }
 0x101   : > { %988 = vmatmul.mubr.bf16.gmra.mxu1 %v822_v59  ;;  %v797_v13 = vmax.f32 %v695_v10, 0.0  ;;  %v706_v17 = vadd.f32 %v2983_v5, %v3497_v43  ;;  %v810_v59 = vmax.f32 %v746_v55, 0.0  ;;  %3007 = vmatpush3.bf16.msra.mxu0 %v3174_v61 }
 0x102   : > { %997 = vmatprep.mubr.bf16.mxu1 %v3325_v40  ;;  %v697_v8 = vpop.f32.mrf.mxu0  ;;  %3008 = vmatprep.subr.bf16.mxu0 %v3175_v2  ;;  %v761_v5 = vpop.f32.mrf.mxu1 }
 0x103   : > { %v698_v11 = vadd.f32 %v3497_v43, %v697_v8  ;;  %v800_v21 = vmax.f32 %v706_v17, 0.0  ;;  %v831_v0 = vpack.c.bf16 %v810_v59, %v809_v58  ;;  %v759_v8 = vadd.f32 %v3497_v43, %v758_v60 }
 0x104   : > { %v2986_v12 = vpop.f32.mrf.mxu0  ;;  %v3002_v10 = vpop.f32.mrf.mxu1  ;;  %v770_v17 = vadd.f32 %v2999_v1, %v3497_v43 }
 0x105   : > { %v798_v14 = vmax.f32 %v698_v11, 0.0  ;;  %v826_v23 = vpack.c.bf16 %v800_v21, %v799_v20  ;;  %v719_v30 = vadd.f32 %v2986_v12, %v3497_v43  ;;  %3009 = vmatpush3.bf16.msra.mxu0 %v3175_v2  ;;  %v3177_v11 = vld [vmem:[%s3950_s6 + $0x18] sm:$0xff]   ;;  %v813_v12 = vmax.f32 %v759_v8, 0.0  ;;  %v3179_v20 = vld [vmem:[%s3950_s6 + $0x8] sm:$0xff]  }
 0x106   : > { %v710_v15 = vpop.f32.mrf.mxu0  ;;  %3010 = vmatprep.subr.bf16.mxu0 %v3176_v6  ;;  %v815_v21 = vmax.f32 %v767_v16, 0.0 }
 0x107   : > { %v825_v18 = vpack.c.bf16 %v798_v14, %v797_v13  ;;  %v711_v24 = vadd.f32 %v3497_v43, %v710_v15  ;;  %v803_v34 = vmax.f32 %v719_v30, 0.0  ;;  %v774_v14 = vpop.f32.mrf.mxu1  ;;  %v3178_v15 = vld [vmem:[%s3950_s6 + $0x10] sm:$0xff]   ;;  %v783_v30 = vadd.f32 %v3002_v10, %v3497_v43 }
 0x108   : > { %v2987_v19 = vpop.f32.mrf.mxu0  ;;  %v775_v26 = vadd.f32 %v3497_v43, %v774_v14 }
 0x109   : > { %998 = vmatmul.mubr.bf16.gmra.mxu1 %v823_v4  ;;  %v801_v27 = vmax.f32 %v711_v24, 0.0  ;;  %v722_v31 = vadd.f32 %v2987_v19, %v3497_v43  ;;  %v812_v4 = vmax.f32 %v754_v63, 0.0  ;;  %3011 = vmatpush3.bf16.msra.mxu0 %v3176_v6  ;;  %v3003_v19 = vpop.f32.mrf.mxu1  ;;  %v3180_v24 = vld [vmem:[%s3950_s6] sm:$0xff]   ;;  %v819_v33 = vmax.f32 %v783_v30, 0.0 }
 0x10a   : > { %1007 = vmatprep.mubr.bf16.mxu1 %v3325_v40  ;;  %v713_v22 = vpop.f32.mrf.mxu0  ;;  %3012 = vmatprep.subr.bf16.mxu0 %v3177_v11 }
 0x10b   : > { %v714_v25 = vadd.f32 %v3497_v43, %v713_v22  ;;  %v804_v35 = vmax.f32 %v722_v31, 0.0  ;;  %v832_v7 = vpack.c.bf16 %v812_v4, %v811_v3  ;;  %v816_v22 = vmax.f32 %v770_v17, 0.0 }
 0x10c   : > { %v786_v31 = vadd.f32 %v3003_v19, %v3497_v43 }
 0x10d   : > { %v802_v28 = vmax.f32 %v714_v25, 0.0  ;;  %v828_v37 = vpack.c.bf16 %v804_v35, %v803_v34  ;;  %3013 = vmatpush3.bf16.msra.mxu0 %v3177_v11  ;;  %v834_v25 = vpack.c.bf16 %v816_v22, %v815_v21  ;;  %v2711_v11 = vld [vmem:[%s3609_s16] sm:$0xff]  }
 0x10e   : > { %3014 = vmatprep.subr.bf16.mxu0 %v3178_v15  ;;  %v820_v34 = vmax.f32 %v786_v31, 0.0  ;;  %v2712_v16 = vunpack.c.l.bf16 %v2711_v11  ;;  %v2713_v21 = vunpack.c.h.bf16 %v2711_v11 }
 0x10f   : > { %v827_v32 = vpack.c.bf16 %v802_v28, %v801_v27  ;;  %v817_v28 = vmax.f32 %v775_v26, 0.0 }
 0x110   : > { %v836_v35 = vpack.c.bf16 %v820_v34, %v819_v33  ;;  %v2854_v33 = vld [vmem:[%s3609_s16 + $0x8] sm:$0xff]  }
 0x111   : > { %1008 = vmatmul.mubr.bf16.gmra.mxu1 %v824_v9  ;;  %v762_v9 = vadd.f32 %v3497_v43, %v761_v5  ;;  %3015 = vmatpush3.bf16.msra.mxu0 %v3178_v15 }
 0x112   : > { %1017 = vmatprep.mubr.bf16.mxu1 %v3325_v40  ;;  %3016 = vmatprep.subr.bf16.mxu0 %v3179_v20 }
 0x113   : > { %v814_v13 = vmax.f32 %v762_v9, 0.0 }
 0x115   : > { %3017 = vmatpush3.bf16.msra.mxu0 %v3179_v20 }
 0x116   : > { %3018 = vmatprep.subr.bf16.mxu0 %v3180_v24 }
 0x119   : > { %1018 = vmatmul.mubr.bf16.gmra.mxu1 %v825_v18  ;;  %v833_v18 = vpack.c.bf16 %v814_v13, %v813_v12  ;;  %3019 = vmatpush3.bf16.msra.mxu0 %v3180_v24 }
 0x11a   : > { %1027 = vmatprep.mubr.bf16.mxu1 %v3325_v40 }
 0x121   : > { %1028 = vmatmul.mubr.bf16.gmra.mxu1 %v826_v23  ;;  %v777_v23 = vpop.f32.mrf.mxu1 }
 0x122   : > { %1037 = vmatprep.mubr.bf16.mxu1 %v3325_v40  ;;  %v778_v27 = vadd.f32 %v3497_v43, %v777_v23 }
 0x124   : > { %v818_v29 = vmax.f32 %v778_v27, 0.0 }
 0x129   : > { %1038 = vmatmul.mubr.bf16.gmra.mxu1 %v827_v32  ;;  %v835_v32 = vpack.c.bf16 %v818_v29, %v817_v28 }
 0x12a   : > { %1047 = vmatprep.mubr.bf16.mxu1 %v3325_v40 }
 0x131   : > { %1048 = vmatmul.mubr.bf16.gmra.mxu1 %v828_v37  ;;  %v856_v37 = vshrl.u32 %v855_v36, 7 }
 0x132   : > { %1057 = vmatprep.mubr.bf16.mxu1 %v3325_v40 }
 0x133   : > { %v857_v38 = vsub.s32 0, %v856_v37  ;;  %v861_v39 = vsub.s32 1, %v856_v37 }
 0x135   : > { %v3573_v42 = vrot.slane %v853_v41, %v857_v38  ;;  %v3575_v43 = vrot.slane %v853_v41, %v861_v39  ;;  %v2716_v41 = vunpack.c.l.bf16 %v2854_v33 }
 0x139   : > { %1058 = vmatmul.mubr.bf16.gmra.mxu1 %v829_v48 }
 0x13a   : > { %1067 = vmatprep.mubr.bf16.mxu1 %v3325_v40 }
 0x141   : > { %1068 = vmatmul.mubr.bf16.gmra.mxu1 %v830_v53 }
 0x142   : > { %1077 = vmatprep.mubr.bf16.mxu1 %v3325_v40 }
 0x149   : > { %1078 = vmatmul.mubr.bf16.gmra.mxu1 %v831_v0 }
 0x14a   : > { %1087 = vmatprep.mubr.bf16.mxu1 %v3325_v40 }
 0x151   : > { %1088 = vmatmul.mubr.bf16.gmra.mxu1 %v832_v7 }
 0x152   : > { %1097 = vmatprep.mubr.bf16.mxu1 %v3325_v40 }
 0x159   : > { %1098 = vmatmul.mubr.bf16.gmra.mxu1 %v833_v18 }
 0x15a   : > { %1107 = vmatprep.mubr.bf16.mxu1 %v3325_v40 }
 0x161   : > { %1108 = vmatmul.mubr.bf16.gmra.mxu1 %v834_v25  ;;  %v3628_v25 = vld [vmem:[%s3952_s8 + $0x38] sm:$0xff]  }
 0x162   : > { %1117 = vmatprep.mubr.bf16.mxu1 %v3325_v40  ;;  %3052 = vmatprep.subr.bf16.mxu0 %v3628_v25 }
 0x169   : > { %1118 = vmatmul.mubr.bf16.gmra.mxu1 %v835_v32 }
 0x16a   : > { %1127 = vmatprep.mubr.bf16.mxu1 %v3325_v40 }
 0x171   : > { %1128 = vmatmul.mubr.bf16.gmra.mxu1 %v836_v35 }
 0x1b9   : > { %v979_v44 = vpop.f32.mrf.mxu1 }
 0x1ba   : > { %v3579_v40 = vadd.f32 %v979_v44, %v3573_v42 }
 0x1bb   : > { %v981_v45 = vpop.f32.mrf.mxu1 }
 0x1bc   : > { %v982_v46 = vadd.f32 %v981_v45, %v3575_v43 }
 0x1bd   : > { %v983_v47 = vpop.f32.mrf.mxu1 }
 0x1be   : > { %v1138_v48 = vmul.f32 0.5, %v982_v46  ;;  %v2678_v49 = vpack.c.bf16 %v982_v46, %v3579_v40  ;;  %v3590_v52 = vadd.f32 %v983_v47, %v3573_v42 }
 0x1bf   : > { %v985_v50 = vpop.f32.mrf.mxu1 }
 0x1c0   : > { %v1170_v51 = vmul.f32 1.442695, %v1138_v48  ;;  %2370 = vst [vmem:[%s3585_s14] sm:$0xff] %v2678_v49  ;;  %v986_v53 = vadd.f32 %v985_v50, %v3575_v43  ;;  %v2717_v48 = vunpack.c.h.bf16 %v2854_v33 }
 0x1c1   : > { %v989_v54 = vpop.f32.mrf.mxu1 }
 0x1c2   : > { %v1139_v55 = vmul.f32 0.5, %v986_v53  ;;  %v2679_v56 = vpack.c.bf16 %v986_v53, %v3590_v52  ;;  %3189 = vpow2.f32 %v1170_v51  ;;  %v3596_v59 = vadd.f32 %v989_v54, %v3573_v42 }
 0x1c3   : > { %v991_v57 = vpop.f32.mrf.mxu1 }
 0x1c4   : > { %v1172_v58 = vmul.f32 1.442695, %v1139_v55  ;;  %2371 = vst [vmem:[%s3585_s14 + $0x8] sm:$0xff] %v2679_v56  ;;  %v992_v60 = vadd.f32 %v991_v57, %v3575_v43 }
 0x1c5   : > { %v993_v61 = vpop.f32.mrf.mxu1 }
 0x1c6   : > { %3191 = vpow2.f32 %v1172_v58  ;;  %v1140_v62 = vmul.f32 0.5, %v992_v60  ;;  %v2680_v63 = vpack.c.bf16 %v992_v60, %v3596_v59  ;;  %v3602_v2 = vadd.f32 %v993_v61, %v3573_v42  ;;  %v2855_v60 = vld [vmem:[%s3609_s16 + $0x10] sm:$0xff]  }
 0x1c7   : > { %v995_v0 = vpop.f32.mrf.mxu1 }
 0x1c8   : > { %v1174_v1 = vmul.f32 1.442695, %v1140_v62  ;;  %2372 = vst [vmem:[%s3585_s14 + $0x10] sm:$0xff] %v2680_v63  ;;  %v996_v3 = vadd.f32 %v995_v0, %v3575_v43 }
 0x1c9   : > { %v999_v4 = vpop.f32.mrf.mxu1 }
 0x1ca   : > { %v1141_v5 = vmul.f32 0.5, %v996_v3  ;;  %v2681_v6 = vpack.c.bf16 %v996_v3, %v3602_v2  ;;  %3193 = vpow2.f32 %v1174_v1  ;;  %v3614_v9 = vadd.f32 %v999_v4, %v3573_v42 }
 0x1cb   : > { %v1001_v7 = vpop.f32.mrf.mxu1  ;;  %v2720_v4 = vunpack.c.l.bf16 %v2855_v60 }
 0x1cc   : > { %v1176_v8 = vmul.f32 1.442695, %v1141_v5  ;;  %2373 = vst [vmem:[%s3585_s14 + $0x18] sm:$0xff] %v2681_v6  ;;  %v1002_v10 = vadd.f32 %v1001_v7, %v3575_v43 }
 0x1cd   : > { %v1003_v12 = vpop.f32.mrf.mxu1 }
 0x1ce   : > { %3195 = vpow2.f32 %v1176_v8  ;;  %v1142_v13 = vmul.f32 0.5, %v1002_v10  ;;  %v2682_v14 = vpack.c.bf16 %v1002_v10, %v3614_v9  ;;  %v3621_v19 = vadd.f32 %v1003_v12, %v3573_v42 }
 0x1cf   : > { %v1005_v15 = vpop.f32.mrf.mxu1  ;;  %v3190_v17 = vpop.eup %3189  ;;  %v2721_v10 = vunpack.c.h.bf16 %v2855_v60 }
 0x1d0   : > { %v1178_v18 = vmul.f32 1.442695, %v1142_v13  ;;  %2374 = vst [vmem:[%s3585_s14 + $0x20] sm:$0xff] %v2682_v14  ;;  %v1006_v20 = vadd.f32 %v1005_v15, %v3575_v43  ;;  %v1298_v28 = vmul.f32 %v3190_v17, %v2712_v16 }
 0x1d1   : > { %v1009_v22 = vpop.f32.mrf.mxu1 }
 0x1d2   : > { %v1143_v23 = vmul.f32 0.5, %v1006_v20  ;;  %v2683_v24 = vpack.c.bf16 %v1006_v20, %v3621_v19  ;;  %3197 = vpow2.f32 %v1178_v18  ;;  %v3632_v30 = vadd.f32 %v1009_v22, %v3573_v42  ;;  %v2856_v22 = vld [vmem:[%s3609_s16 + $0x18] sm:$0xff]  }
 0x1d3   : > { %v3192_v26 = vpop.eup %3191  ;;  %v1011_v27 = vpop.f32.mrf.mxu1  ;;  %v1330_v38 = vadd.f32 %v1298_v28, %v3579_v40 }
 0x1d4   : > { %v1180_v29 = vmul.f32 1.442695, %v1143_v23  ;;  %2375 = vst [vmem:[%s3585_s14 + $0x28] sm:$0xff] %v2683_v24  ;;  %v1012_v31 = vadd.f32 %v1011_v27, %v3575_v43  ;;  %v1299_v32 = vmul.f32 %v3192_v26, %v2713_v21  ;;  %v3183_v24 = vld [vmem:[%s3952_s8 + $0x28] sm:$0xff]  }
 0x1d5   : > { %v1013_v34 = vpop.f32.mrf.mxu1 }
 0x1d6   : > { %3199 = vpow2.f32 %v1180_v29  ;;  %v1144_v35 = vmul.f32 0.5, %v1012_v31  ;;  %v2684_v36 = vpack.c.bf16 %v1012_v31, %v3632_v30  ;;  %v1331_v39 = vadd.f32 %v1299_v32, %v3590_v52 }
 0x1d7   : > { %v1015_v37 = vpop.f32.mrf.mxu1  ;;  %v3194_v44 = vpop.eup %3193  ;;  %v3642_v46 = vadd.f32 %v1013_v34, %v3573_v42  ;;  %v2724_v32 = vunpack.c.l.bf16 %v2856_v22 }
 0x1d8   : > { %v1182_v45 = vmul.f32 1.442695, %v1144_v35  ;;  %2376 = vst [vmem:[%s3585_s14 + $0x30] sm:$0xff] %v2684_v36  ;;  %v1016_v47 = vadd.f32 %v1015_v37, %v3575_v43  ;;  %v1362_v50 = vpack.c.bf16 %v1331_v39, %v1330_v38  ;;  %v1300_v54 = vmul.f32 %v3194_v44, %v2716_v41 }
 0x1d9   : > { %v1019_v49 = vpop.f32.mrf.mxu1  ;;  %v2725_v36 = vunpack.c.h.bf16 %v2856_v22 }
 0x1da   : > { %v1145_v51 = vmul.f32 0.5, %v1016_v47  ;;  %v2685_v53 = vpack.c.bf16 %v1016_v47, %v3642_v46  ;;  %3201 = vpow2.f32 %v1182_v45  ;;  %3020 = vmatprep.mubr.bf16.mxu0 %v1362_v50  ;;  %v3648_v56 = vadd.f32 %v1019_v49, %v3573_v42 }
 0x1db   : > { %v3196_v40 = vpop.eup %3195  ;;  %v1021_v52 = vpop.f32.mrf.mxu1  ;;  %v1332_v1 = vadd.f32 %v1300_v54, %v3596_v59  ;;  %v3182_v59 = vld [vmem:[%s3952_s8 + $0x30] sm:$0xff]  }
 0x1dc   : > { %v1184_v55 = vmul.f32 1.442695, %v1145_v51  ;;  %2377 = vst [vmem:[%s3585_s14 + $0x38] sm:$0xff] %v2685_v53  ;;  %v1022_v57 = vadd.f32 %v1021_v52, %v3575_v43  ;;  %v1301_v58 = vmul.f32 %v3196_v40, %v2717_v48  ;;  %v2857_v51 = vld [vmem:[%s3609_s16 + $0x20] sm:$0xff]   ;;  %v3185_v40 = vld [vmem:[%s3952_s8 + $0x18] sm:$0xff]  }
 0x1dd   : > { %v1023_v61 = vpop.f32.mrf.mxu1  ;;  %v2728_v60 = vunpack.c.l.bf16 %v2857_v51 }
 0x1de   : > { %3203 = vpow2.f32 %v1184_v55  ;;  %v1146_v62 = vmul.f32 0.5, %v1022_v57  ;;  %v2686_v63 = vpack.c.bf16 %v1022_v57, %v3648_v56  ;;  %v1333_v3 = vadd.f32 %v1301_v58, %v3602_v2 }
 0x1df   : > { %v1025_v0 = vpop.f32.mrf.mxu1  ;;  %v3198_v5 = vpop.eup %3197  ;;  %v3657_v7 = vadd.f32 %v1023_v61, %v3573_v42 }
 0x1e0   : > { %v1186_v6 = vmul.f32 1.442695, %v1146_v62  ;;  %2378 = vst [vmem:[%s3585_s14 + $0x40] sm:$0xff] %v2686_v63  ;;  %v1026_v8 = vadd.f32 %v1025_v0, %v3575_v43  ;;  %v1363_v12 = vpack.c.bf16 %v1333_v3, %v1332_v1  ;;  %v1302_v16 = vmul.f32 %v3198_v5, %v2720_v4 }
 0x1e1   : > { %v1029_v11 = vpop.f32.mrf.mxu1  ;;  %v2729_v1 = vunpack.c.h.bf16 %v2857_v51 }
 0x1e2   : > { %v1147_v13 = vmul.f32 0.5, %v1026_v8  ;;  %v2687_v2 = vpack.c.bf16 %v1026_v8, %v3657_v7  ;;  %3205 = vpow2.f32 %v1186_v6  ;;  %3021 = vmatmul.mubr.bf16.vlgmr.msra.gmra.mxu0 %v1363_v12  ;;  %v3666_v18 = vadd.f32 %v1029_v11, %v3573_v42 }
 0x1e3   : > { %v3200_v14 = vpop.eup %3199  ;;  %v1031_v15 = vpop.f32.mrf.mxu1  ;;  %3053 = vmatpush3.bf16.msra.mxu0 %v3628_v25  ;;  %v1334_v29 = vadd.f32 %v1302_v16, %v3614_v9  ;;  %v3184_v9 = vld [vmem:[%s3952_s8 + $0x20] sm:$0xff]  }
 0x1e4   : > { %v1188_v17 = vmul.f32 1.442695, %v1147_v13  ;;  %2379 = vst [vmem:[%s3585_s14 + $0x48] sm:$0xff] %v2687_v2  ;;  %v1032_v20 = vadd.f32 %v1031_v15, %v3575_v43  ;;  %v1303_v21 = vmul.f32 %v3200_v14, %v2721_v10  ;;  %3054 = vmatprep.subr.bf16.mxu0 %v3182_v59  ;;  %v2858_v13 = vld [vmem:[%s3609_s16 + $0x28] sm:$0xff]  }
 0x1e5   : > { %v1033_v23 = vpop.f32.mrf.mxu1 }
 0x1e6   : > { %3207 = vpow2.f32 %v1188_v17  ;;  %v1148_v26 = vmul.f32 0.5, %v1032_v20  ;;  %v2688_v27 = vpack.c.bf16 %v1032_v20, %v3666_v18  ;;  %v1335_v31 = vadd.f32 %v1303_v21, %v3621_v19 }
 0x1e7   : > { %v1035_v28 = vpop.f32.mrf.mxu1  ;;  %v3202_v33 = vpop.eup %3201  ;;  %v3679_v25 = vadd.f32 %v1033_v23, %v3573_v42  ;;  %3055 = vmatpush3.bf16.msra.mxu0 %v3182_v59  ;;  %v2732_v21 = vunpack.c.l.bf16 %v2858_v13 }
 0x1e8   : > { %v1190_v34 = vmul.f32 1.442695, %v1148_v26  ;;  %2380 = vst [vmem:[%s3585_s14 + $0x50] sm:$0xff] %v2688_v27  ;;  %v1036_v35 = vadd.f32 %v1035_v28, %v3575_v43  ;;  %v1364_v38 = vpack.c.bf16 %v1335_v31, %v1334_v29  ;;  %3056 = vmatprep.subr.bf16.mxu0 %v3183_v24  ;;  %v1304_v45 = vmul.f32 %v3202_v33, %v2724_v32 }
 0x1e9   : > { %v1039_v37 = vpop.f32.mrf.mxu1  ;;  %v2733_v27 = vunpack.c.h.bf16 %v2858_v13 }
 0x1ea   : > { %v1149_v19 = vmul.f32 0.5, %v1036_v35  ;;  %v2689_v39 = vpack.c.bf16 %v1036_v35, %v3679_v25  ;;  %3209 = vpow2.f32 %v1190_v34  ;;  %3024 = vmatprep.mubr.bf16.mxu0 %v1364_v38  ;;  %v3688_v48 = vadd.f32 %v1039_v37, %v3573_v42  ;;  %v2859_v38 = vld [vmem:[%s3609_s16 + $0x30] sm:$0xff]  }
 0x1eb   : > { %v3204_v41 = vpop.eup %3203  ;;  %v1041_v44 = vpop.f32.mrf.mxu1  ;;  %3057 = vmatpush3.bf16.msra.mxu0 %v3183_v24  ;;  %v1336_v57 = vadd.f32 %v1304_v45, %v3632_v30 }
 0x1ec   : > { %v1192_v47 = vmul.f32 1.442695, %v1149_v19  ;;  %2381 = vst [vmem:[%s3585_s14 + $0x58] sm:$0xff] %v2689_v39  ;;  %v1042_v49 = vadd.f32 %v1041_v44, %v3575_v43  ;;  %v1305_v50 = vmul.f32 %v3204_v41, %v2725_v36  ;;  %3058 = vmatprep.subr.bf16.mxu0 %v3184_v9 }
 0x1ed   : > { %v1043_v53 = vpop.f32.mrf.mxu1 }
 0x1ee   : > { %3211 = vpow2.f32 %v1192_v47  ;;  %v1150_v52 = vmul.f32 0.5, %v1042_v49  ;;  %v2690_v54 = vpack.c.bf16 %v1042_v49, %v3688_v48  ;;  %v1337_v58 = vadd.f32 %v1305_v50, %v3642_v46 }
 0x1ef   : > { %v1045_v55 = vpop.f32.mrf.mxu1  ;;  %v3206_v61 = vpop.eup %3205  ;;  %v3700_v63 = vadd.f32 %v1043_v53, %v3573_v42  ;;  %3059 = vmatpush3.bf16.msra.mxu0 %v3184_v9  ;;  %v2736_v47 = vunpack.c.l.bf16 %v2859_v38 }
 0x1f0   : > { %v1194_v62 = vmul.f32 1.442695, %v1150_v52  ;;  %2382 = vst [vmem:[%s3585_s14 + $0x60] sm:$0xff] %v2690_v54  ;;  %v1046_v0 = vadd.f32 %v1045_v55, %v3575_v43  ;;  %v1365_v4 = vpack.c.bf16 %v1337_v58, %v1336_v57  ;;  %3060 = vmatprep.subr.bf16.mxu0 %v3185_v40  ;;  %v1306_v8 = vmul.f32 %v3206_v61, %v2728_v60 }
 0x1f1   : > { %v1049_v3 = vpop.f32.mrf.mxu1 }
 0x1f2   : > { %v1151_v5 = vmul.f32 0.5, %v1046_v0  ;;  %v2691_v30 = vpack.c.bf16 %v1046_v0, %v3700_v63  ;;  %3213 = vpow2.f32 %v1194_v62  ;;  %3025 = vmatmul.mubr.bf16.gmra.mxu0 %v1365_v4  ;;  %v3706_v11 = vadd.f32 %v1049_v3, %v3573_v42 }
 0x1f3   : > { %v3208_v46 = vpop.eup %3207  ;;  %v1051_v6 = vpop.f32.mrf.mxu1  ;;  %3061 = vmatpush3.bf16.msra.mxu0 %v3185_v40  ;;  %v1338_v17 = vadd.f32 %v1306_v8, %v3648_v56  ;;  %v2737_v40 = vunpack.c.h.bf16 %v2859_v38 }
 0x1f4   : > { %v1196_v10 = vmul.f32 1.442695, %v1151_v5  ;;  %2383 = vst [vmem:[%s3585_s14 + $0x68] sm:$0xff] %v2691_v30  ;;  %v1052_v12 = vadd.f32 %v1051_v6, %v3575_v43  ;;  %v1307_v59 = vmul.f32 %v3208_v46, %v2729_v1  ;;  %v2860_v1 = vld [vmem:[%s3609_s16 + $0x38] sm:$0xff]  }
 0x1f5   : > { %v1053_v2 = vpop.f32.mrf.mxu1  ;;  %v2740_v8 = vunpack.c.l.bf16 %v2860_v1 }
 0x1f6   : > { %3215 = vpow2.f32 %v1196_v10  ;;  %v1152_v14 = vmul.f32 0.5, %v1052_v12  ;;  %v2692_v15 = vpack.c.bf16 %v1052_v12, %v3706_v11  ;;  %v1339_v20 = vadd.f32 %v1307_v59, %v3657_v7 }
 0x1f7   : > { %v1055_v16 = vpop.f32.mrf.mxu1  ;;  %v3210_v22 = vpop.eup %3209  ;;  %v3715_v24 = vadd.f32 %v1053_v2, %v3573_v42  ;;  %v2741_v2 = vunpack.c.h.bf16 %v2860_v1 }
 0x1f8   : > { %v1198_v23 = vmul.f32 1.442695, %v1152_v14  ;;  %2384 = vst [vmem:[%s3585_s14 + $0x70] sm:$0xff] %v2692_v15  ;;  %v1056_v26 = vadd.f32 %v1055_v16, %v3575_v43  ;;  %v1366_v29 = vpack.c.bf16 %v1339_v20, %v1338_v17  ;;  %v1308_v33 = vmul.f32 %v3210_v22, %v2732_v21 }
 0x1f9   : > { %v1059_v28 = vpop.f32.mrf.mxu1 }
 0x1fa   : > { %v1153_v31 = vmul.f32 0.5, %v1056_v26  ;;  %v2693_v32 = vpack.c.bf16 %v1056_v26, %v3715_v24  ;;  %3217 = vpow2.f32 %v1198_v23  ;;  %3028 = vmatprep.mubr.bf16.mxu0 %v1366_v29  ;;  %v3721_v35 = vadd.f32 %v1059_v28, %v3573_v42 }
 0x1fb   : > { %v3212_v56 = vpop.eup %3211  ;;  %v1061_v7 = vpop.f32.mrf.mxu1  ;;  %v1340_v44 = vadd.f32 %v1308_v33, %v3666_v18 }
 0x1fc   : > { %v1200_v34 = vmul.f32 1.442695, %v1153_v31  ;;  %2385 = vst [vmem:[%s3585_s14 + $0x78] sm:$0xff] %v2693_v32  ;;  %v1062_v36 = vadd.f32 %v1061_v7, %v3575_v43  ;;  %v1309_v37 = vmul.f32 %v3212_v56, %v2733_v27  ;;  %v2861_v27 = vld [vmem:[%s3609_s16 + $0x40] sm:$0xff]  }
 0x1fd   : > { %v1063_v9 = vpop.f32.mrf.mxu1  ;;  %v2744_v33 = vunpack.c.l.bf16 %v2861_v27 }
 0x1fe   : > { %3219 = vpow2.f32 %v1200_v34  ;;  %v1154_v19 = vmul.f32 0.5, %v1062_v36  ;;  %v2694_v39 = vpack.c.bf16 %v1062_v36, %v3721_v35  ;;  %v1341_v45 = vadd.f32 %v1309_v37, %v3679_v25 }
 0x1ff   : > { %v1065_v41 = vpop.f32.mrf.mxu1  ;;  %v3214_v49 = vpop.eup %3213  ;;  %v3730_v51 = vadd.f32 %v1063_v9, %v3573_v42  ;;  %v2745_v9 = vunpack.c.h.bf16 %v2861_v27 }
 0x200   : > { %v1202_v50 = vmul.f32 1.442695, %v1154_v19  ;;  %2386 = vst [vmem:[%s3585_s14 + $0x80] sm:$0xff] %v2694_v39  ;;  %v1066_v53 = vadd.f32 %v1065_v41, %v3575_v43  ;;  %v1367_v54 = vpack.c.bf16 %v1341_v45, %v1340_v44  ;;  %v1310_v58 = vmul.f32 %v3214_v49, %v2736_v47 }
 0x201   : > { %v1069_v52 = vpop.f32.mrf.mxu1 }
 0x202   : > { %v1155_v55 = vmul.f32 0.5, %v1066_v53  ;;  %v2695_v57 = vpack.c.bf16 %v1066_v53, %v3730_v51  ;;  %3221 = vpow2.f32 %v1202_v50  ;;  %3029 = vmatmul.mubr.bf16.gmra.mxu0 %v1367_v54  ;;  %v3736_v61 = vadd.f32 %v1069_v52, %v3573_v42 }
 0x203   : > { %v3216_v18 = vpop.eup %3215  ;;  %v1071_v25 = vpop.f32.mrf.mxu1  ;;  %v1342_v46 = vadd.f32 %v1310_v58, %v3688_v48 }
 0x204   : > { %v1204_v60 = vmul.f32 1.442695, %v1155_v55  ;;  %2387 = vst [vmem:[%s3585_s14 + $0x88] sm:$0xff] %v2695_v57  ;;  %v1072_v62 = vadd.f32 %v1071_v25, %v3575_v43  ;;  %v1311_v0 = vmul.f32 %v3216_v18, %v2737_v40  ;;  %v2862_v40 = vld [vmem:[%s3609_s16 + $0x48] sm:$0xff]  }
 0x205   : > { %v1073_v3 = vpop.f32.mrf.mxu1  ;;  %v2748_v58 = vunpack.c.l.bf16 %v2862_v40 }
 0x206   : > { %3223 = vpow2.f32 %v1204_v60  ;;  %v1156_v4 = vmul.f32 0.5, %v1072_v62  ;;  %v2696_v5 = vpack.c.bf16 %v1072_v62, %v3736_v61  ;;  %v1343_v6 = vadd.f32 %v1311_v0, %v3700_v63 }
 0x207   : > { %v1075_v30 = vpop.f32.mrf.mxu1  ;;  %v3218_v10 = vpop.eup %3217  ;;  %v3745_v59 = vadd.f32 %v1073_v3, %v3573_v42  ;;  %v2749_v3 = vunpack.c.h.bf16 %v2862_v40 }
 0x208   : > { %v1206_v12 = vmul.f32 1.442695, %v1156_v4  ;;  %2388 = vst [vmem:[%s3585_s14 + $0x90] sm:$0xff] %v2696_v5  ;;  %v1076_v13 = vadd.f32 %v1075_v30, %v3575_v43  ;;  %v1368_v15 = vpack.c.bf16 %v1343_v6, %v1342_v46  ;;  %v1312_v20 = vmul.f32 %v3218_v10, %v2740_v8 }
 0x209   : > { %v1079_v14 = vpop.f32.mrf.mxu1 }
 0x20a   : > { %v1157_v16 = vmul.f32 0.5, %v1076_v13  ;;  %v2697_v17 = vpack.c.bf16 %v1076_v13, %v3745_v59  ;;  %3225 = vpow2.f32 %v1206_v12  ;;  %3032 = vmatprep.mubr.bf16.mxu0 %v1368_v15  ;;  %v3751_v22 = vadd.f32 %v1079_v14, %v3573_v42 }
 0x20b   : > { %v3220_v48 = vpop.eup %3219  ;;  %v1081_v63 = vpop.f32.mrf.mxu1  ;;  %v1344_v56 = vadd.f32 %v1312_v20, %v3706_v11 }
 0x20c   : > { %v1208_v21 = vmul.f32 1.442695, %v1157_v16  ;;  %2389 = vst [vmem:[%s3585_s14 + $0x98] sm:$0xff] %v2697_v17  ;;  %v1082_v23 = vadd.f32 %v1081_v63, %v3575_v43  ;;  %v1313_v26 = vmul.f32 %v3220_v48, %v2741_v2  ;;  %v2863_v2 = vld [vmem:[%s3609_s16 + $0x50] sm:$0xff]  }
 0x20d   : > { %v1083_v28 = vpop.f32.mrf.mxu1  ;;  %v2752_v20 = vunpack.c.l.bf16 %v2863_v2 }
 0x20e   : > { %3227 = vpow2.f32 %v1208_v21  ;;  %v1158_v29 = vmul.f32 0.5, %v1082_v23  ;;  %v2698_v31 = vpack.c.bf16 %v1082_v23, %v3751_v22  ;;  %v1345_v7 = vadd.f32 %v1313_v26, %v3715_v24 }
 0x20f   : > { %v1085_v32 = vpop.f32.mrf.mxu1  ;;  %v3222_v34 = vpop.eup %3221  ;;  %v3760_v37 = vadd.f32 %v1083_v28, %v3573_v42  ;;  %v2753_v28 = vunpack.c.h.bf16 %v2863_v2 }
 0x210   : > { %v1210_v36 = vmul.f32 1.442695, %v1158_v29  ;;  %2390 = vst [vmem:[%s3585_s14 + $0xa0] sm:$0xff] %v2698_v31  ;;  %v1086_v38 = vadd.f32 %v1085_v32, %v3575_v43  ;;  %v1369_v39 = vpack.c.bf16 %v1345_v7, %v1344_v56  ;;  %v1314_v45 = vmul.f32 %v3222_v34, %v2744_v33  ;;  %v3186_v33 = vld [vmem:[%s3952_s8 + $0x10] sm:$0xff]  }
 0x211   : > { %v1089_v19 = vpop.f32.mrf.mxu1  ;;  %3062 = vmatprep.subr.bf16.mxu0 %v3186_v33 }
 0x212   : > { %v1159_v41 = vmul.f32 0.5, %v1086_v38  ;;  %v2699_v44 = vpack.c.bf16 %v1086_v38, %v3760_v37  ;;  %3229 = vpow2.f32 %v1210_v36  ;;  %3033 = vmatmul.mubr.bf16.gmra.mxu0 %v1369_v39  ;;  %v3766_v49 = vadd.f32 %v1089_v19, %v3573_v42  ;;  %v2864_v19 = vld [vmem:[%s3609_s16 + $0x58] sm:$0xff]  }
 0x213   : > { %v3224_v11 = vpop.eup %3223  ;;  %v1091_v24 = vpop.f32.mrf.mxu1  ;;  %v1346_v18 = vadd.f32 %v1314_v45, %v3721_v35  ;;  %3063 = vmatpush3.bf16.msra.mxu0 %v3186_v33 }
 0x214   : > { %v1212_v47 = vmul.f32 1.442695, %v1159_v41  ;;  %2391 = vst [vmem:[%s3585_s14 + $0xa8] sm:$0xff] %v2699_v44  ;;  %v1092_v50 = vadd.f32 %v1091_v24, %v3575_v43  ;;  %v1315_v53 = vmul.f32 %v3224_v11, %v2745_v9 }
 0x215   : > { %v1093_v52 = vpop.f32.mrf.mxu1 }
 0x216   : > { %3231 = vpow2.f32 %v1212_v47  ;;  %v1160_v54 = vmul.f32 0.5, %v1092_v50  ;;  %v2700_v55 = vpack.c.bf16 %v1092_v50, %v3766_v49  ;;  %v1347_v25 = vadd.f32 %v1315_v53, %v3730_v51  ;;  %v3187_v50 = vld [vmem:[%s3952_s8 + $0x8] sm:$0xff]  }
 0x217   : > { %v1095_v57 = vpop.f32.mrf.mxu1  ;;  %v3226_v60 = vpop.eup %3225  ;;  %v3775_v0 = vadd.f32 %v1093_v52, %v3573_v42  ;;  %v2756_v47 = vunpack.c.l.bf16 %v2864_v19  ;;  %3064 = vmatprep.subr.bf16.mxu0 %v3187_v50 }
 0x218   : > { %v1214_v62 = vmul.f32 1.442695, %v1160_v54  ;;  %2392 = vst [vmem:[%s3585_s14 + $0xb0] sm:$0xff] %v2700_v55  ;;  %v1096_v1 = vadd.f32 %v1095_v57, %v3575_v43  ;;  %v1370_v5 = vpack.c.bf16 %v1347_v25, %v1346_v18  ;;  %v1316_v6 = vmul.f32 %v3226_v60, %v2748_v58  ;;  %3065 = vmatpush3.bf16.msra.mxu0 %v3187_v50 }
 0x219   : > { %v1099_v4 = vpop.f32.mrf.mxu1  ;;  %v2757_v55 = vunpack.c.h.bf16 %v2864_v19 }
 0x21a   : > { %v1161_v30 = vmul.f32 0.5, %v1096_v1  ;;  %v2701_v46 = vpack.c.bf16 %v1096_v1, %v3775_v0  ;;  %3233 = vpow2.f32 %v1214_v62  ;;  %3036 = vmatprep.mubr.bf16.mxu0 %v1370_v5  ;;  %v3781_v10 = vadd.f32 %v1099_v4, %v3573_v42  ;;  %v3188_v62 = vld [vmem:[%s3952_s8] sm:$0xff]  }
 0x21b   : > { %v3228_v35 = vpop.eup %3227  ;;  %v1101_v51 = vpop.f32.mrf.mxu1  ;;  %v1348_v48 = vadd.f32 %v1316_v6, %v3736_v61  ;;  %3066 = vmatprep.subr.bf16.mxu0 %v3188_v62 }
 0x21c   : > { %v1216_v8 = vmul.f32 1.442695, %v1161_v30  ;;  %2393 = vst [vmem:[%s3585_s14 + $0xb8] sm:$0xff] %v2701_v46  ;;  %v1102_v12 = vadd.f32 %v1101_v51, %v3575_v43  ;;  %v1317_v13 = vmul.f32 %v3228_v35, %v2749_v3  ;;  %v2865_v30 = vld [vmem:[%s3609_s16 + $0x60] sm:$0xff]   ;;  %3067 = vmatpush3.bf16.msra.mxu0 %v3188_v62 }
 0x21d   : > { %v1103_v14 = vpop.f32.mrf.mxu1 }
 0x21e   : > { %3235 = vpow2.f32 %v1216_v8  ;;  %v1162_v15 = vmul.f32 0.5, %v1102_v12  ;;  %v2702_v16 = vpack.c.bf16 %v1102_v12, %v3781_v10  ;;  %v1349_v63 = vadd.f32 %v1317_v13, %v3745_v59 }
 0x21f   : > { %v1105_v17 = vpop.f32.mrf.mxu1  ;;  %v3230_v21 = vpop.eup %3229  ;;  %v3790_v26 = vadd.f32 %v1103_v14, %v3573_v42  ;;  %v2760_v13 = vunpack.c.l.bf16 %v2865_v30 }
 0x220   : > { %v1218_v23 = vmul.f32 1.442695, %v1162_v15  ;;  %2394 = vst [vmem:[%s3585_s14 + $0xc0] sm:$0xff] %v2702_v16  ;;  %v1106_v27 = vadd.f32 %v1105_v17, %v3575_v43  ;;  %v1371_v31 = vpack.c.bf16 %v1349_v63, %v1348_v48  ;;  %v1318_v7 = vmul.f32 %v3230_v21, %v2752_v20 }
 0x221   : > { %v1109_v29 = vpop.f32.mrf.mxu1  ;;  %v2761_v17 = vunpack.c.h.bf16 %v2865_v30 }
 0x222   : > { %v1163_v32 = vmul.f32 0.5, %v1106_v27  ;;  %v2703_v56 = vpack.c.bf16 %v1106_v27, %v3790_v26  ;;  %3237 = vpow2.f32 %v1218_v23  ;;  %3037 = vmatmul.mubr.bf16.gmra.mxu0 %v1371_v31  ;;  %v3799_v36 = vadd.f32 %v1109_v29, %v3573_v42  ;;  %v2866_v27 = vld [vmem:[%s3609_s16 + $0x68] sm:$0xff]  }
 0x223   : > { %v3232_v61 = vpop.eup %3231  ;;  %v1111_v59 = vpop.f32.mrf.mxu1  ;;  %v1350_v24 = vadd.f32 %v1318_v7, %v3751_v22  ;;  %v2764_v7 = vunpack.c.l.bf16 %v2866_v27 }
 0x224   : > { %v1220_v34 = vmul.f32 1.442695, %v1163_v32  ;;  %2395 = vst [vmem:[%s3585_s14 + $0xc8] sm:$0xff] %v2703_v56  ;;  %v1112_v38 = vadd.f32 %v1111_v59, %v3575_v43  ;;  %v1319_v9 = vmul.f32 %v3232_v61, %v2753_v28 }
 0x225   : > { %v1113_v39 = vpop.f32.mrf.mxu1 }
 0x226   : > { %3239 = vpow2.f32 %v1220_v34  ;;  %v1164_v41 = vmul.f32 0.5, %v1112_v38  ;;  %v2704_v44 = vpack.c.bf16 %v1112_v38, %v3799_v36  ;;  %v1351_v45 = vadd.f32 %v1319_v9, %v3760_v37 }
 0x227   : > { %v1115_v11 = vpop.f32.mrf.mxu1  ;;  %v3234_v53 = vpop.eup %3233  ;;  %v3811_v52 = vadd.f32 %v1113_v39, %v3573_v42 }
 0x228   : > { %v1222_v40 = vmul.f32 1.442695, %v1164_v41  ;;  %2396 = vst [vmem:[%s3585_s14 + $0xd0] sm:$0xff] %v2704_v44  ;;  %v1116_v54 = vadd.f32 %v1115_v11, %v3575_v43  ;;  %v1372_v18 = vpack.c.bf16 %v1351_v45, %v1350_v24  ;;  %v1320_v60 = vmul.f32 %v3234_v53, %v2756_v47  ;;  %v2867_v53 = vld [vmem:[%s3609_s16 + $0x70] sm:$0xff]  }
 0x229   : > { %v1119_v57 = vpop.f32.mrf.mxu1  ;;  %v2765_v44 = vunpack.c.h.bf16 %v2866_v27 }
 0x22a   : > { %3241 = vpow2.f32 %v1222_v40  ;;  %v1165_v22 = vmul.f32 0.5, %v1116_v54  ;;  %v2705_v37 = vpack.c.bf16 %v1116_v54, %v3811_v52  ;;  %3040 = vmatprep.mubr.bf16.mxu0 %v1372_v18  ;;  %v3820_v3 = vadd.f32 %v1119_v57, %v3573_v42 }
 0x22b   : > { %v3236_v25 = vpop.eup %3235  ;;  %v1121_v58 = vpop.f32.mrf.mxu1  ;;  %v1352_v8 = vadd.f32 %v1320_v60, %v3766_v49  ;;  %v2768_v54 = vunpack.c.l.bf16 %v2867_v53  ;;  %v2769_v57 = vunpack.c.h.bf16 %v2867_v53 }
 0x22c   : > { %v1224_v1 = vmul.f32 1.442695, %v1165_v22  ;;  %2397 = vst [vmem:[%s3585_s14 + $0xd8] sm:$0xff] %v2705_v37  ;;  %v1122_v4 = vadd.f32 %v1121_v58, %v3575_v43  ;;  %v1321_v5 = vmul.f32 %v3236_v25, %v2757_v55  ;;  %v2868_v37 = vld [vmem:[%s3609_s16 + $0x78] sm:$0xff]  }
 0x22d   : > { %v1123_v46 = vpop.f32.mrf.mxu1  ;;  %v2772_v62 = vunpack.c.l.bf16 %v2868_v37 }
 0x22e   : > { %3243 = vpow2.f32 %v1224_v1  ;;  %v1166_v35 = vmul.f32 0.5, %v1122_v4  ;;  %v2706_v51 = vpack.c.bf16 %v1122_v4, %v3820_v3  ;;  %v1353_v12 = vadd.f32 %v1321_v5, %v3775_v0 }
 0x22f   : > { %v1125_v6 = vpop.f32.mrf.mxu1  ;;  %v3238_v2 = vpop.eup %3237  ;;  %v1124_v15 = vadd.f32 %v1123_v46, %v3573_v42  ;;  %v2773_v5 = vunpack.c.h.bf16 %v2868_v37 }
 0x230   : > { %v1226_v14 = vmul.f32 1.442695, %v1166_v35  ;;  %2398 = vst [vmem:[%s3585_s14 + $0xe0] sm:$0xff] %v2706_v51  ;;  %v1126_v16 = vadd.f32 %v1125_v6, %v3575_v43  ;;  %v1373_v63 = vpack.c.bf16 %v1353_v12, %v1352_v8  ;;  %v1322_v0 = vmul.f32 %v3238_v2, %v2760_v13  ;;  %v3848_v12 = vld [vmem:[%s3951_s7] ss:$0 sm:$0xff] }
 0x231   : > { %v1129_v48 = vpop.f32.mrf.mxu1 }
 0x232   : > { %3245 = vpow2.f32 %v1226_v14  ;;  %v1167_v20 = vmul.f32 0.5, %v1126_v16  ;;  %v2707_v21 = vpack.c.bf16 %v1126_v16, %v1124_v15  ;;  %3041 = vmatmul.mubr.bf16.gmra.mxu0 %v1373_v63  ;;  %v1130_v29 = vadd.f32 %v1129_v48, %v3573_v42 }
 0x233   : > { %v3240_v23 = vpop.eup %3239  ;;  %v1131_v49 = vpop.f32.mrf.mxu1  ;;  %v1354_v38 = vadd.f32 %v1322_v0, %v3781_v10 }
 0x234   : > { %v1228_v28 = vmul.f32 1.442695, %v1167_v20  ;;  %2399 = vst [vmem:[%s3585_s14 + $0xe8] sm:$0xff] %v2707_v21  ;;  %v1132_v31 = vadd.f32 %v1131_v49, %v3575_v43  ;;  %v1323_v32 = vmul.f32 %v3240_v23, %v2761_v17 }
 0x235   : > { %v1133_v56 = vpop.f32.mrf.mxu1 }
 0x236   : > { %3247 = vpow2.f32 %v1228_v28  ;;  %v1168_v61 = vmul.f32 0.5, %v1132_v31  ;;  %v2708_v59 = vpack.c.bf16 %v1132_v31, %v1130_v29  ;;  %v1355_v9 = vadd.f32 %v1323_v32, %v3790_v26 }
 0x237   : > { %v3242_v33 = vpop.eup %3241  ;;  %v1135_v34 = vpop.f32.mrf.mxu1  ;;  %v1134_v39 = vadd.f32 %v1133_v56, %v3573_v42 }
 0x238   : > { %v1230_v19 = vmul.f32 1.442695, %v1168_v61  ;;  %2400 = vst [vmem:[%s3585_s14 + $0xf0] sm:$0xff] %v2708_v59  ;;  %v1136_v41 = vadd.f32 %v1135_v34, %v3575_v43  ;;  %v1374_v11 = vpack.c.bf16 %v1355_v9, %v1354_v38  ;;  %v1324_v47 = vmul.f32 %v3242_v33, %v2764_v7 }
 0x23a   : > { %3249 = vpow2.f32 %v1230_v19  ;;  %v1169_v24 = vmul.f32 0.5, %v1136_v41  ;;  %v2709_v45 = vpack.c.bf16 %v1136_v41, %v1134_v39  ;;  %3044 = vmatprep.mubr.bf16.mxu0 %v1374_v11  ;;  %v1356_v26 = vadd.f32 %v1324_v47, %v3799_v36 }
 0x23b   : > { %v3244_v50 = vpop.eup %3243 }
 0x23c   : > { %v1232_v10 = vmul.f32 1.442695, %v1169_v24  ;;  %2401 = vst [vmem:[%s3585_s14 + $0xf8] sm:$0xff] %v2709_v45  ;;  %v1325_v40 = vmul.f32 %v3244_v50, %v2765_v44 }
 0x23e   : > { %3251 = vpow2.f32 %v1232_v10  ;;  %v1357_v42 = vadd.f32 %v1325_v40, %v3811_v52 }
 0x23f   : > { %v3246_v43 = vpop.eup %3245 }
 0x240   : > { %v1375_v55 = vpack.c.bf16 %v1357_v42, %v1356_v26  ;;  %v1326_v18 = vmul.f32 %v3246_v43, %v2768_v54 }
 0x242   : > { %3045 = vmatmul.mubr.bf16.gmra.mxu0 %v1375_v55  ;;  %v1358_v58 = vadd.f32 %v1326_v18, %v3820_v3 }
 0x243   : > { %v3248_v22 = vpop.eup %3247 }
 0x244   : > { %v1327_v25 = vmul.f32 %v3248_v22, %v2769_v57 }
 0x246   : > { %v1359_v60 = vadd.f32 %v1327_v25, %v1124_v15 }
 0x247   : > { %v3250_v1 = vpop.eup %3249 }
 0x248   : > { %v1376_v4 = vpack.c.bf16 %v1359_v60, %v1358_v58  ;;  %v1328_v36 = vmul.f32 %v3250_v1, %v2772_v62 }
 0x24a   : > { %3048 = vmatprep.mubr.bf16.mxu0 %v1376_v4  ;;  %v1360_v46 = vadd.f32 %v1328_v36, %v1130_v29 }
 0x24b   : > { %v3252_v30 = vpop.eup %3251 }
 0x24c   : > { %v1329_v52 = vmul.f32 %v3252_v30, %v2773_v5 }
 0x24e   : > { %v1361_v35 = vadd.f32 %v1329_v52, %v1134_v39 }
 0x250   : > { %v1377_v51 = vpack.c.bf16 %v1361_v35, %v1360_v46 }
 0x252   : > { %3049 = vmatmul.mubr.bf16.gmra.mxu0 %v1377_v51 }
 0x2a2   : > { %v3022_v6 = vpop.f32.mrf.mxu0 }
 0x2a3   : > { %v1492_v14 = vadd.f32 %v3022_v6, %v3848_v12 }
 0x2a4   : > { %v1483_v8 = vpop.f32.mrf.mxu0 }
 0x2a5   : > { %v1484_v13 = vadd.f32 %v3848_v12, %v1483_v8  ;;  %v1612_v20 = vmax.f32 %v1492_v14, 0.0 }
 0x2a6   : > { %v3023_v3 = vpop.f32.mrf.mxu0 }
 0x2a7   : > { %v1495_v2 = vadd.f32 %v3023_v3, %v3848_v12  ;;  %v1610_v48 = vmax.f32 %v1484_v13, 0.0 }
 0x2a8   : > { %v1486_v15 = vpop.f32.mrf.mxu0 }
 0x2a9   : > { %v1487_v16 = vadd.f32 %v3848_v12, %v1486_v15  ;;  %v1613_v17 = vmax.f32 %v1495_v2, 0.0 }
 0x2ab   : > { %v1611_v63 = vmax.f32 %v1487_v16, 0.0  ;;  %v1643_v23 = vpack.c.bf16 %v1613_v17, %v1612_v20 }
 0x2ad   : > { %v1642_v21 = vpack.c.bf16 %v1611_v63, %v1610_v48 }
 0x2af   : > { %3068 = vmatprep.mubr.bf16.mxu0 %v1642_v21 }
 0x2b0   : > { %3069 = vmatmul.mubr.bf16.vlgmr.msra.gmra.mxu0 %v1643_v23 }
 0x2b2   : > { %v3026_v49 = vpop.f32.mrf.mxu0 }
 0x2b3   : > { %v1508_v31 = vadd.f32 %v3026_v49, %v3848_v12 }
 0x2b4   : > { %v1499_v0 = vpop.f32.mrf.mxu0 }
 0x2b5   : > { %v1500_v28 = vadd.f32 %v3848_v12, %v1499_v0  ;;  %v1616_v33 = vmax.f32 %v1508_v31, 0.0 }
 0x2b6   : > { %v3027_v27 = vpop.f32.mrf.mxu0 }
 0x2b7   : > { %v1511_v29 = vadd.f32 %v3027_v27, %v3848_v12  ;;  %v1614_v59 = vmax.f32 %v1500_v28, 0.0 }
 0x2b8   : > { %v1502_v32 = vpop.f32.mrf.mxu0 }
 0x2b9   : > { %v1503_v56 = vadd.f32 %v3848_v12, %v1502_v32  ;;  %v1617_v61 = vmax.f32 %v1511_v29, 0.0 }
 0x2bb   : > { %v1615_v7 = vmax.f32 %v1503_v56, 0.0  ;;  %v1645_v38 = vpack.c.bf16 %v1617_v61, %v1616_v33 }
 0x2bd   : > { %v1644_v34 = vpack.c.bf16 %v1615_v7, %v1614_v59 }
 0x2bf   : > { %3072 = vmatprep.mubr.bf16.mxu0 %v1644_v34 }
 0x2c0   : > { %3073 = vmatmul.mubr.bf16.gmra.mxu0 %v1645_v38 }
 0x2c2   : > { %v3030_v9 = vpop.f32.mrf.mxu0 }
 0x2c3   : > { %v1524_v11 = vadd.f32 %v3030_v9, %v3848_v12 }
 0x2c4   : > { %v1515_v19 = vpop.f32.mrf.mxu0 }
 0x2c5   : > { %v1516_v41 = vadd.f32 %v3848_v12, %v1515_v19  ;;  %v1620_v10 = vmax.f32 %v1524_v11, 0.0 }
 0x2c6   : > { %v3031_v39 = vpop.f32.mrf.mxu0 }
 0x2c7   : > { %v1527_v44 = vadd.f32 %v3031_v39, %v3848_v12  ;;  %v1618_v50 = vmax.f32 %v1516_v41, 0.0 }
 0x2c8   : > { %v1518_v24 = vpop.f32.mrf.mxu0 }
 0x2c9   : > { %v1519_v45 = vadd.f32 %v3848_v12, %v1518_v24  ;;  %v1621_v47 = vmax.f32 %v1527_v44, 0.0 }
 0x2cb   : > { %v1619_v53 = vmax.f32 %v1519_v45, 0.0  ;;  %v1647_v26 = vpack.c.bf16 %v1621_v47, %v1620_v10 }
 0x2cd   : > { %v1646_v40 = vpack.c.bf16 %v1619_v53, %v1618_v50 }
 0x2cf   : > { %3076 = vmatprep.mubr.bf16.mxu0 %v1646_v40 }
 0x2d0   : > { %3077 = vmatmul.mubr.bf16.gmra.mxu0 %v1647_v26 }
 0x2d2   : > { %v3034_v42 = vpop.f32.mrf.mxu0 }
 0x2d3   : > { %v1540_v18 = vadd.f32 %v3034_v42, %v3848_v12 }
 0x2d4   : > { %v1531_v54 = vpop.f32.mrf.mxu0 }
 0x2d5   : > { %v1532_v55 = vadd.f32 %v3848_v12, %v1531_v54  ;;  %v1624_v62 = vmax.f32 %v1540_v18, 0.0 }
 0x2d6   : > { %v3035_v43 = vpop.f32.mrf.mxu0 }
 0x2d7   : > { %v1543_v57 = vadd.f32 %v3035_v43, %v3848_v12  ;;  %v1622_v58 = vmax.f32 %v1532_v55, 0.0 }
 0x2d8   : > { %v1534_v22 = vpop.f32.mrf.mxu0 }
 0x2d9   : > { %v1535_v37 = vadd.f32 %v3848_v12, %v1534_v22  ;;  %v1625_v25 = vmax.f32 %v1543_v57, 0.0 }
 0x2db   : > { %v1623_v60 = vmax.f32 %v1535_v37, 0.0  ;;  %v1649_v4 = vpack.c.bf16 %v1625_v25, %v1624_v62  ;;  %v3885_v37 = vld [vmem:[%s3953_s9] ss:$0 sm:$0xff] }
 0x2dd   : > { %v1648_v1 = vpack.c.bf16 %v1623_v60, %v1622_v58 }
 0x2df   : > { %3080 = vmatprep.mubr.bf16.mxu0 %v1648_v1 }
 0x2e0   : > { %3081 = vmatmul.mubr.bf16.gmra.mxu0 %v1649_v4 }
 0x2e2   : > { %v3038_v5 = vpop.f32.mrf.mxu0 }
 0x2e3   : > { %v1556_v35 = vadd.f32 %v3038_v5, %v3848_v12 }
 0x2e4   : > { %v1547_v36 = vpop.f32.mrf.mxu0 }
 0x2e5   : > { %v1548_v52 = vadd.f32 %v3848_v12, %v1547_v36  ;;  %v1628_v2 = vmax.f32 %v1556_v35, 0.0 }
 0x2e6   : > { %v3039_v30 = vpop.f32.mrf.mxu0 }
 0x2e7   : > { %v1559_v46 = vadd.f32 %v3039_v30, %v3848_v12  ;;  %v1626_v3 = vmax.f32 %v1548_v52, 0.0 }
 0x2e8   : > { %v1550_v51 = vpop.f32.mrf.mxu0 }
 0x2e9   : > { %v1551_v6 = vadd.f32 %v3848_v12, %v1550_v51  ;;  %v1629_v8 = vmax.f32 %v1559_v46, 0.0 }
 0x2eb   : > { %v1627_v13 = vmax.f32 %v1551_v6, 0.0  ;;  %v1651_v15 = vpack.c.bf16 %v1629_v8, %v1628_v2 }
 0x2ed   : > { %v1650_v14 = vpack.c.bf16 %v1627_v13, %v1626_v3 }
 0x2ef   : > { %3084 = vmatprep.mubr.bf16.mxu0 %v1650_v14 }
 0x2f0   : > { %3085 = vmatmul.mubr.bf16.gmra.mxu0 %v1651_v15 }
 0x2f2   : > { %v3042_v16 = vpop.f32.mrf.mxu0 }
 0x2f3   : > { %v1572_v21 = vadd.f32 %v3042_v16, %v3848_v12 }
 0x2f4   : > { %v1563_v17 = vpop.f32.mrf.mxu0 }
 0x2f5   : > { %v1564_v63 = vadd.f32 %v3848_v12, %v1563_v17  ;;  %v1632_v29 = vmax.f32 %v1572_v21, 0.0 }
 0x2f6   : > { %v3043_v48 = vpop.f32.mrf.mxu0 }
 0x2f7   : > { %v1575_v20 = vadd.f32 %v3043_v48, %v3848_v12  ;;  %v1630_v27 = vmax.f32 %v1564_v63, 0.0 }
 0x2f8   : > { %v1566_v23 = vpop.f32.mrf.mxu0 }
 0x2f9   : > { %v1567_v49 = vadd.f32 %v3848_v12, %v1566_v23  ;;  %v1633_v0 = vmax.f32 %v1575_v20, 0.0 }
 0x2fb   : > { %v1631_v28 = vmax.f32 %v1567_v49, 0.0  ;;  %v1653_v32 = vpack.c.bf16 %v1633_v0, %v1632_v29 }
 0x2fd   : > { %v1652_v31 = vpack.c.bf16 %v1631_v28, %v1630_v27 }
 0x2ff   : > { %3088 = vmatprep.mubr.bf16.mxu0 %v1652_v31 }
 0x300   : > { %3089 = vmatmul.mubr.bf16.gmra.mxu0 %v1653_v32 }
 0x302   : > { %v3046_v56 = vpop.f32.mrf.mxu0 }
 0x303   : > { %v1588_v34 = vadd.f32 %v3046_v56, %v3848_v12 }
 0x304   : > { %v1579_v61 = vpop.f32.mrf.mxu0 }
 0x305   : > { %v1580_v7 = vadd.f32 %v3848_v12, %v1579_v61  ;;  %v1636_v44 = vmax.f32 %v1588_v34, 0.0 }
 0x306   : > { %v3047_v59 = vpop.f32.mrf.mxu0 }
 0x307   : > { %v1591_v33 = vadd.f32 %v3047_v59, %v3848_v12  ;;  %v1634_v39 = vmax.f32 %v1580_v7, 0.0 }
 0x308   : > { %v1582_v38 = vpop.f32.mrf.mxu0 }
 0x309   : > { %v1583_v9 = vadd.f32 %v3848_v12, %v1582_v38  ;;  %v1637_v19 = vmax.f32 %v1591_v33, 0.0 }
 0x30b   : > { %v1635_v41 = vmax.f32 %v1583_v9, 0.0  ;;  %v1655_v24 = vpack.c.bf16 %v1637_v19, %v1636_v44 }
 0x30d   : > { %v1654_v11 = vpack.c.bf16 %v1635_v41, %v1634_v39 }
 0x30f   : > { %3092 = vmatprep.mubr.bf16.mxu0 %v1654_v11 }
 0x310   : > { %3093 = vmatmul.mubr.bf16.gmra.mxu0 %v1655_v24 }
 0x312   : > { %v3050_v45 = vpop.f32.mrf.mxu0 }
 0x313   : > { %v1604_v40 = vadd.f32 %v3050_v45, %v3848_v12 }
 0x314   : > { %v1595_v47 = vpop.f32.mrf.mxu0 }
 0x315   : > { %v1596_v53 = vadd.f32 %v3848_v12, %v1595_v47  ;;  %v1640_v57 = vmax.f32 %v1604_v40, 0.0 }
 0x316   : > { %v3051_v50 = vpop.f32.mrf.mxu0 }
 0x317   : > { %v1607_v10 = vadd.f32 %v3051_v50, %v3848_v12  ;;  %v1638_v43 = vmax.f32 %v1596_v53, 0.0 }
 0x318   : > { %v1598_v26 = vpop.f32.mrf.mxu0 }
 0x319   : > { %v1599_v42 = vadd.f32 %v3848_v12, %v1598_v26  ;;  %v1641_v54 = vmax.f32 %v1607_v10, 0.0 }
 0x31b   : > { %v1639_v55 = vmax.f32 %v1599_v42, 0.0  ;;  %v1657_v22 = vpack.c.bf16 %v1641_v54, %v1640_v57 }
 0x31d   : > { %v1656_v18 = vpack.c.bf16 %v1639_v55, %v1638_v43 }
 0x31f   : > { %3096 = vmatprep.mubr.bf16.mxu0 %v1656_v18 }
 0x320   : > { %3097 = vmatmul.mubr.bf16.gmra.mxu0 %v1657_v22 }
 0x370   : > { %v3070_v25 = vpop.f32.mrf.mxu0 }
 0x371   : > { %v1772_v58 = vadd.f32 %v3070_v25, %v3885_v37 }
 0x372   : > { %v1763_v60 = vpop.f32.mrf.mxu0 }
 0x373   : > { %v1892_v62 = vmul.f32 0.5, %v1772_v58  ;;  %v1764_v12 = vadd.f32 %v3885_v37, %v1763_v60 }
 0x374   : > { %v3071_v1 = vpop.f32.mrf.mxu0 }
 0x375   : > { %3253 = vtanh.f32 %v1892_v62  ;;  %v1890_v4 = vmul.f32 0.5, %v1764_v12  ;;  %v1775_v5 = vadd.f32 %v3071_v1, %v3885_v37 }
 0x376   : > { %v1766_v36 = vpop.f32.mrf.mxu0 }
 0x377   : > { %3255 = vtanh.f32 %v1890_v4  ;;  %v1893_v30 = vmul.f32 0.5, %v1775_v5  ;;  %v1767_v52 = vadd.f32 %v3885_v37, %v1766_v36 }
 0x379   : > { %3257 = vtanh.f32 %v1893_v30  ;;  %v1891_v46 = vmul.f32 0.5, %v1767_v52 }
 0x37b   : > { %3259 = vtanh.f32 %v1891_v46 }
 0x380   : > { %v3074_v35 = vpop.f32.mrf.mxu0 }
 0x381   : > { %v1788_v51 = vadd.f32 %v3074_v35, %v3885_v37 }
 0x382   : > { %v3254_v6 = vpop.eup %3253  ;;  %v1779_v8 = vpop.f32.mrf.mxu0 }
 0x383   : > { %v1896_v3 = vmul.f32 0.5, %v1788_v51  ;;  %v1780_v13 = vadd.f32 %v3885_v37, %v1779_v8  ;;  %v1956_v15 = vadd.f32 1.0, %v3254_v6 }
 0x384   : > { %v3256_v2 = vpop.eup %3255  ;;  %v3075_v14 = vpop.f32.mrf.mxu0 }
 0x385   : > { %v1894_v16 = vmul.f32 0.5, %v1780_v13  ;;  %3261 = vtanh.f32 %v1896_v3  ;;  %v1791_v48 = vadd.f32 %v3075_v14, %v3885_v37  ;;  %v1954_v20 = vadd.f32 1.0, %v3256_v2 }
 0x386   : > { %v3258_v17 = vpop.eup %3257  ;;  %v1782_v63 = vpop.f32.mrf.mxu0  ;;  %v1988_v27 = vmul.f32 0.5, %v1956_v15 }
 0x387   : > { %v1957_v21 = vadd.f32 1.0, %v3258_v17  ;;  %3263 = vtanh.f32 %v1894_v16  ;;  %v1783_v23 = vadd.f32 %v3885_v37, %v1782_v63  ;;  %v1897_v0 = vmul.f32 0.5, %v1791_v48 }
 0x388   : > { %v3260_v49 = vpop.eup %3259  ;;  %v1986_v32 = vmul.f32 0.5, %v1954_v20 }
 0x389   : > { %v1989_v28 = vmul.f32 0.5, %v1957_v21  ;;  %v1955_v29 = vadd.f32 1.0, %v3260_v49  ;;  %v1895_v31 = vmul.f32 0.5, %v1783_v23  ;;  %3265 = vtanh.f32 %v1897_v0 }
 0x38b   : > { %v2782_v56 = vpack.c.bf16 %v1989_v28, %v1988_v27  ;;  %v1987_v61 = vmul.f32 0.5, %v1955_v29  ;;  %3267 = vtanh.f32 %v1895_v31 }
 0x38d   : > { %2869 = vst [vmem:[%s3899_s23 + $0x8] sm:$0xff] %v2782_v56   ;;  %v2777_v59 = vpack.c.bf16 %v1987_v61, %v1986_v32 }
 0x38f   : > { %2778 = vst [vmem:[%s3899_s23] sm:$0xff] %v2777_v59  }
 0x390   : > { %v3078_v7 = vpop.f32.mrf.mxu0 }
 0x391   : > { %v1804_v33 = vadd.f32 %v3078_v7, %v3885_v37 }
 0x392   : > { %v1795_v34 = vpop.f32.mrf.mxu0  ;;  %v3262_v38 = vpop.eup %3261 }
 0x393   : > { %v1900_v9 = vmul.f32 0.5, %v1804_v33  ;;  %v1796_v19 = vadd.f32 %v3885_v37, %v1795_v34  ;;  %v1960_v11 = vadd.f32 1.0, %v3262_v38 }
 0x394   : > { %v3264_v39 = vpop.eup %3263  ;;  %v3079_v41 = vpop.f32.mrf.mxu0 }
 0x395   : > { %v1898_v44 = vmul.f32 0.5, %v1796_v19  ;;  %3269 = vtanh.f32 %v1900_v9  ;;  %v1807_v24 = vadd.f32 %v3079_v41, %v3885_v37  ;;  %v1958_v50 = vadd.f32 1.0, %v3264_v39 }
 0x396   : > { %v1798_v45 = vpop.f32.mrf.mxu0  ;;  %v3266_v47 = vpop.eup %3265  ;;  %v1992_v43 = vmul.f32 0.5, %v1960_v11 }
 0x397   : > { %3271 = vtanh.f32 %v1898_v44  ;;  %v1799_v53 = vadd.f32 %v3885_v37, %v1798_v45  ;;  %v1961_v40 = vadd.f32 1.0, %v3266_v47  ;;  %v1901_v26 = vmul.f32 0.5, %v1807_v24 }
 0x398   : > { %v3268_v10 = vpop.eup %3267  ;;  %v1990_v57 = vmul.f32 0.5, %v1958_v50 }
 0x399   : > { %v1959_v42 = vadd.f32 1.0, %v3268_v10  ;;  %v1899_v54 = vmul.f32 0.5, %v1799_v53  ;;  %v1993_v55 = vmul.f32 0.5, %v1961_v40  ;;  %3273 = vtanh.f32 %v1901_v26 }
 0x39b   : > { %v1991_v18 = vmul.f32 0.5, %v1959_v42  ;;  %3275 = vtanh.f32 %v1899_v54  ;;  %v2792_v22 = vpack.c.bf16 %v1993_v55, %v1992_v43 }
 0x39d   : > { %v2787_v25 = vpack.c.bf16 %v1991_v18, %v1990_v57  ;;  %2871 = vst [vmem:[%s3899_s23 + $0x18] sm:$0xff] %v2792_v22  }
 0x39f   : > { %2870 = vst [vmem:[%s3899_s23 + $0x10] sm:$0xff] %v2787_v25  }
 0x3a0   : > { %v3082_v58 = vpop.f32.mrf.mxu0 }
 0x3a1   : > { %v1820_v60 = vadd.f32 %v3082_v58, %v3885_v37 }
 0x3a2   : > { %v1811_v62 = vpop.f32.mrf.mxu0  ;;  %v3270_v12 = vpop.eup %3269 }
 0x3a3   : > { %v1904_v1 = vmul.f32 0.5, %v1820_v60  ;;  %v1812_v4 = vadd.f32 %v3885_v37, %v1811_v62  ;;  %v1964_v52 = vadd.f32 1.0, %v3270_v12 }
 0x3a4   : > { %v3272_v5 = vpop.eup %3271  ;;  %v3083_v36 = vpop.f32.mrf.mxu0 }
 0x3a5   : > { %v1902_v30 = vmul.f32 0.5, %v1812_v4  ;;  %3277 = vtanh.f32 %v1904_v1  ;;  %v1823_v46 = vadd.f32 %v3083_v36, %v3885_v37  ;;  %v1962_v6 = vadd.f32 1.0, %v3272_v5 }
 0x3a6   : > { %v1814_v35 = vpop.f32.mrf.mxu0  ;;  %v3274_v51 = vpop.eup %3273  ;;  %v1996_v16 = vmul.f32 0.5, %v1964_v52 }
 0x3a7   : > { %3279 = vtanh.f32 %v1902_v30  ;;  %v1815_v8 = vadd.f32 %v3885_v37, %v1814_v35  ;;  %v1965_v13 = vadd.f32 1.0, %v3274_v51  ;;  %v1905_v2 = vmul.f32 0.5, %v1823_v46 }
 0x3a8   : > { %v3276_v3 = vpop.eup %3275  ;;  %v1994_v48 = vmul.f32 0.5, %v1962_v6 }
 0x3a9   : > { %v1963_v14 = vadd.f32 1.0, %v3276_v3  ;;  %v1903_v15 = vmul.f32 0.5, %v1815_v8  ;;  %v1997_v17 = vmul.f32 0.5, %v1965_v13  ;;  %3281 = vtanh.f32 %v1905_v2 }
 0x3ab   : > { %v1995_v63 = vmul.f32 0.5, %v1963_v14  ;;  %3283 = vtanh.f32 %v1903_v15  ;;  %v2802_v20 = vpack.c.bf16 %v1997_v17, %v1996_v16 }
 0x3ad   : > { %v2797_v21 = vpack.c.bf16 %v1995_v63, %v1994_v48  ;;  %2873 = vst [vmem:[%s3899_s23 + $0x28] sm:$0xff] %v2802_v20  }
 0x3af   : > { %2872 = vst [vmem:[%s3899_s23 + $0x20] sm:$0xff] %v2797_v21  }
 0x3b0   : > { %v3086_v23 = vpop.f32.mrf.mxu0 }
 0x3b1   : > { %v1836_v49 = vadd.f32 %v3086_v23, %v3885_v37 }
 0x3b2   : > { %v1827_v0 = vpop.f32.mrf.mxu0  ;;  %v3278_v27 = vpop.eup %3277 }
 0x3b3   : > { %v1908_v28 = vmul.f32 0.5, %v1836_v49  ;;  %v1828_v29 = vadd.f32 %v3885_v37, %v1827_v0  ;;  %v1968_v61 = vadd.f32 1.0, %v3278_v27 }
 0x3b4   : > { %v3280_v31 = vpop.eup %3279  ;;  %v3087_v32 = vpop.f32.mrf.mxu0 }
 0x3b5   : > { %v1906_v56 = vmul.f32 0.5, %v1828_v29  ;;  %3285 = vtanh.f32 %v1908_v28  ;;  %v1839_v59 = vadd.f32 %v3087_v32, %v3885_v37  ;;  %v1966_v34 = vadd.f32 1.0, %v3280_v31 }
 0x3b6   : > { %v1830_v7 = vpop.f32.mrf.mxu0  ;;  %v3282_v33 = vpop.eup %3281  ;;  %v2000_v11 = vmul.f32 0.5, %v1968_v61 }
 0x3b7   : > { %3287 = vtanh.f32 %v1906_v56  ;;  %v1831_v38 = vadd.f32 %v3885_v37, %v1830_v7  ;;  %v1969_v19 = vadd.f32 1.0, %v3282_v33  ;;  %v1909_v39 = vmul.f32 0.5, %v1839_v59 }
 0x3b8   : > { %v3284_v9 = vpop.eup %3283  ;;  %v1998_v45 = vmul.f32 0.5, %v1966_v34 }
 0x3b9   : > { %v1967_v41 = vadd.f32 1.0, %v3284_v9  ;;  %v1907_v44 = vmul.f32 0.5, %v1831_v38  ;;  %v2001_v24 = vmul.f32 0.5, %v1969_v19  ;;  %3289 = vtanh.f32 %v1909_v39 }
 0x3bb   : > { %v1999_v47 = vmul.f32 0.5, %v1967_v41  ;;  %3291 = vtanh.f32 %v1907_v44  ;;  %v2812_v50 = vpack.c.bf16 %v2001_v24, %v2000_v11 }
 0x3bd   : > { %v2807_v53 = vpack.c.bf16 %v1999_v47, %v1998_v45  ;;  %2875 = vst [vmem:[%s3899_s23 + $0x38] sm:$0xff] %v2812_v50  }
 0x3bf   : > { %2874 = vst [vmem:[%s3899_s23 + $0x30] sm:$0xff] %v2807_v53  }
 0x3c0   : > { %v3090_v10 = vpop.f32.mrf.mxu0 }
 0x3c1   : > { %v1852_v40 = vadd.f32 %v3090_v10, %v3885_v37 }
 0x3c2   : > { %v1843_v26 = vpop.f32.mrf.mxu0  ;;  %v3286_v42 = vpop.eup %3285 }
 0x3c3   : > { %v1912_v54 = vmul.f32 0.5, %v1852_v40  ;;  %v1844_v43 = vadd.f32 %v3885_v37, %v1843_v26  ;;  %v1972_v22 = vadd.f32 1.0, %v3286_v42 }
 0x3c4   : > { %v3288_v55 = vpop.eup %3287  ;;  %v3091_v57 = vpop.f32.mrf.mxu0 }
 0x3c5   : > { %v1910_v18 = vmul.f32 0.5, %v1844_v43  ;;  %3293 = vtanh.f32 %v1912_v54  ;;  %v1855_v25 = vadd.f32 %v3091_v57, %v3885_v37  ;;  %v1970_v62 = vadd.f32 1.0, %v3288_v55 }
 0x3c6   : > { %v1846_v58 = vpop.f32.mrf.mxu0  ;;  %v3290_v60 = vpop.eup %3289  ;;  %v2004_v52 = vmul.f32 0.5, %v1972_v22 }
 0x3c7   : > { %3295 = vtanh.f32 %v1910_v18  ;;  %v1847_v12 = vadd.f32 %v3885_v37, %v1846_v58  ;;  %v1973_v4 = vadd.f32 1.0, %v3290_v60  ;;  %v1913_v5 = vmul.f32 0.5, %v1855_v25 }
 0x3c8   : > { %v3292_v1 = vpop.eup %3291  ;;  %v2002_v35 = vmul.f32 0.5, %v1970_v62 }
 0x3c9   : > { %v1971_v36 = vadd.f32 1.0, %v3292_v1  ;;  %v1911_v30 = vmul.f32 0.5, %v1847_v12  ;;  %v2005_v46 = vmul.f32 0.5, %v1973_v4  ;;  %3297 = vtanh.f32 %v1913_v5 }
 0x3cb   : > { %v2003_v51 = vmul.f32 0.5, %v1971_v36  ;;  %3299 = vtanh.f32 %v1911_v30  ;;  %v2822_v6 = vpack.c.bf16 %v2005_v46, %v2004_v52 }
 0x3cd   : > { %v2817_v8 = vpack.c.bf16 %v2003_v51, %v2002_v35  ;;  %2877 = vst [vmem:[%s3899_s23 + $0x48] sm:$0xff] %v2822_v6  }
 0x3cf   : > { %2876 = vst [vmem:[%s3899_s23 + $0x40] sm:$0xff] %v2817_v8  }
 0x3d0   : > { %v3094_v3 = vpop.f32.mrf.mxu0 }
 0x3d1   : > { %v1868_v13 = vadd.f32 %v3094_v3, %v3885_v37 }
 0x3d2   : > { %v1859_v2 = vpop.f32.mrf.mxu0  ;;  %v3294_v16 = vpop.eup %3293 }
 0x3d3   : > { %v1916_v14 = vmul.f32 0.5, %v1868_v13  ;;  %v1860_v15 = vadd.f32 %v3885_v37, %v1859_v2  ;;  %v1976_v23 = vadd.f32 1.0, %v3294_v16 }
 0x3d4   : > { %v3095_v17 = vpop.f32.mrf.mxu0  ;;  %v3296_v48 = vpop.eup %3295 }
 0x3d5   : > { %3301 = vtanh.f32 %v1916_v14  ;;  %v1914_v63 = vmul.f32 0.5, %v1860_v15  ;;  %v1871_v20 = vadd.f32 %v3095_v17, %v3885_v37  ;;  %v1974_v28 = vadd.f32 1.0, %v3296_v48 }
 0x3d6   : > { %v1862_v21 = vpop.f32.mrf.mxu0  ;;  %v3298_v27 = vpop.eup %3297  ;;  %v2008_v61 = vmul.f32 0.5, %v1976_v23 }
 0x3d7   : > { %3303 = vtanh.f32 %v1914_v63  ;;  %v1917_v49 = vmul.f32 0.5, %v1871_v20  ;;  %v1863_v0 = vadd.f32 %v3885_v37, %v1862_v21  ;;  %v1977_v31 = vadd.f32 1.0, %v3298_v27 }
 0x3d8   : > { %v3300_v29 = vpop.eup %3299  ;;  %v2006_v7 = vmul.f32 0.5, %v1974_v28 }
 0x3d9   : > { %3305 = vtanh.f32 %v1917_v49  ;;  %v1915_v32 = vmul.f32 0.5, %v1863_v0  ;;  %v1975_v56 = vadd.f32 1.0, %v3300_v29  ;;  %v2009_v59 = vmul.f32 0.5, %v1977_v31 }
 0x3db   : > { %3307 = vtanh.f32 %v1915_v32  ;;  %v2007_v33 = vmul.f32 0.5, %v1975_v56  ;;  %v2832_v34 = vpack.c.bf16 %v2009_v59, %v2008_v61 }
 0x3dd   : > { %v2827_v38 = vpack.c.bf16 %v2007_v33, %v2006_v7  ;;  %2879 = vst [vmem:[%s3899_s23 + $0x58] sm:$0xff] %v2832_v34  }
 0x3df   : > { %2878 = vst [vmem:[%s3899_s23 + $0x50] sm:$0xff] %v2827_v38  }
 0x3e0   : > { %v3098_v9 = vpop.f32.mrf.mxu0 }
 0x3e1   : > { %v1884_v19 = vadd.f32 %v3098_v9, %v3885_v37 }
 0x3e2   : > { %v3302_v39 = vpop.eup %3301  ;;  %v1875_v41 = vpop.f32.mrf.mxu0 }
 0x3e3   : > { %v1920_v44 = vmul.f32 0.5, %v1884_v19  ;;  %v1876_v11 = vadd.f32 %v3885_v37, %v1875_v41  ;;  %v1980_v47 = vadd.f32 1.0, %v3302_v39 }
 0x3e4   : > { %v3304_v24 = vpop.eup %3303  ;;  %v3099_v45 = vpop.f32.mrf.mxu0 }
 0x3e5   : > { %v1918_v50 = vmul.f32 0.5, %v1876_v11  ;;  %3309 = vtanh.f32 %v1920_v44  ;;  %v1887_v10 = vadd.f32 %v3099_v45, %v3885_v37  ;;  %v1978_v26 = vadd.f32 1.0, %v3304_v24 }
 0x3e6   : > { %v3306_v53 = vpop.eup %3305  ;;  %v1878_v40 = vpop.f32.mrf.mxu0  ;;  %v2012_v57 = vmul.f32 0.5, %v1980_v47 }
 0x3e7   : > { %v1981_v42 = vadd.f32 1.0, %v3306_v53  ;;  %3311 = vtanh.f32 %v1918_v50  ;;  %v1879_v54 = vadd.f32 %v3885_v37, %v1878_v40  ;;  %v1921_v55 = vmul.f32 0.5, %v1887_v10 }
 0x3e8   : > { %v3308_v43 = vpop.eup %3307  ;;  %v2010_v58 = vmul.f32 0.5, %v1978_v26 }
 0x3e9   : > { %v2013_v18 = vmul.f32 0.5, %v1981_v42  ;;  %v1979_v22 = vadd.f32 1.0, %v3308_v43  ;;  %v1919_v25 = vmul.f32 0.5, %v1879_v54  ;;  %3313 = vtanh.f32 %v1921_v55 }
 0x3eb   : > { %v2842_v60 = vpack.c.bf16 %v2013_v18, %v2012_v57  ;;  %v2011_v62 = vmul.f32 0.5, %v1979_v22  ;;  %3315 = vtanh.f32 %v1919_v25 }
 0x3ed   : > { %2881 = vst [vmem:[%s3899_s23 + $0x68] sm:$0xff] %v2842_v60   ;;  %v2837_v12 = vpack.c.bf16 %v2011_v62, %v2010_v58 }
 0x3ef   : > { %2880 = vst [vmem:[%s3899_s23 + $0x60] sm:$0xff] %v2837_v12  }
 0x3f2   : > { %v3310_v1 = vpop.eup %3309 }
 0x3f3   : > { %v1984_v5 = vadd.f32 1.0, %v3310_v1 }
 0x3f4   : > { %v3312_v4 = vpop.eup %3311 }
 0x3f5   : > { %v1982_v36 = vadd.f32 1.0, %v3312_v4  ;;  %v2016_v35 = vmul.f32 0.5, %v1984_v5 }
 0x3f6   : > { %v3314_v37 = vpop.eup %3313 }
 0x3f7   : > { %v1985_v52 = vadd.f32 1.0, %v3314_v37  ;;  %v2014_v6 = vmul.f32 0.5, %v1982_v36 }
 0x3f8   : > { %v3316_v30 = vpop.eup %3315 }
 0x3f9   : > { %v1983_v46 = vadd.f32 1.0, %v3316_v30  ;;  %v2017_v51 = vmul.f32 0.5, %v1985_v52 }
 0x3fb   : > { %v2015_v8 = vmul.f32 0.5, %v1983_v46  ;;  %v2852_v3 = vpack.c.bf16 %v2017_v51, %v2016_v35 }
 0x3fd   : > { %v2847_v13 = vpack.c.bf16 %v2015_v8, %v2014_v6  ;;  %2883 = vst [vmem:[%s3899_s23 + $0x78] sm:$0xff] %v2852_v3  }
 0x3ff   : > { %2882 = vst [vmem:[%s3899_s23 + $0x70] sm:$0xff] %v2847_v13  }
 0x400 PF: > { %s22_s17 = sadd.s32 1, %s3323_s17  }
 0x401   : > { %p19_p4 = scmp.ge.s32.totalorder %s22_s17, 4  }
 0x403   :  { %21 = sbr.rel (!%p19_p4) target bundleno = 1 (0x1), region = 105 }

</bundles_post_ra>
